<compile_context>
chip_gen: v6e
topology: v6e:2x2x1
jax: 0.10.0
libtpu: 0.0.40
codegen_flags: <defaults>
</compile_context>

<pallas_src>
import functools

import jax
import jax.numpy as jnp
from jax import lax
from jax.experimental import pallas as pl
from jax.experimental.pallas import tpu as pltpu

SUBLANE = 8  # f32 sublane tile height


# ---------------------------------------------------------------------------
# Fused Pallas kernel
# ---------------------------------------------------------------------------
def _make_fused_kernel(S, Bpad):
    """Returns a kernel closed over the static sequence length / padded batch."""

    def kernel(x_ref,        # (S*Bpad, Fa+Fv)   bf16   [xa | xv]
               wih_ref,      # (Fa+Fv, 8H)       bf16   fused input proj
               whhs_ref,     # (2H, 8H)          bf16   stacked subnet W_hh
               bs_ref,       # (1, 8H)           f32
               wm_ref,       # (2H+Hm, 4Hm)      bf16   packed [W_ih_m ; W_hh_m]
               bm_ref,       # (1, 4Hm)          f32
               wout_ref,     # (Hm, Ppad)        bf16
               bout_ref,     # (1, Ppad)         f32
               out_ref,      # (S*Bpad, Ppad)    f32
               xg_scr,       # VMEM (S*Bpad, 8H) f32    staged input projection
               hm_scr,       # VMEM (S*Bpad, Hm) f32    master hidden sequence
               hc_scr):      # VMEM (Bpad, 2H+Hm) bf16  contiguous [h_sub|h_m]
        H2, G2 = whhs_ref.shape          # 2H, 8H   (stacked acous|visual)
        Hm = wout_ref.shape[0]
        Gm = wm_ref.shape[1]             # 4Hm
        H = H2 // 2

        # ---- fused, time-parallel input projection for BOTH subnets
        #      (ONE bf16 matmul over all S*Bpad rows), staged to VMEM so the
        #      recurrence reads sublane-aligned per-step views.
        xg_scr[...] = (jnp.dot(x_ref[...], wih_ref[...],
                               preferred_element_type=jnp.float32)
                       + bs_ref[...])

        # Weights / broadcasts / activation constants built ONCE (hoisted).
        whh_s = whhs_ref[...]
        w_m = wm_ref[...]
        bm_b = jnp.broadcast_to(bm_ref[...], (Bpad, Gm))

        # Single-EUP gate activation constants:
        #   tanh(x) = 2*sigmoid(2x) - 1
        #   act = sigmoid(x*scale)*scale + off,  scale=2/off=-1 on the cell-
        #   candidate ('g') lanes, scale=1/off=0 elsewhere.
        lane_s = lax.broadcasted_iota(jnp.int32, (Bpad, G2), 1)
        gmask_s = (lane_s >= 4 * H) & (lane_s < 6 * H)
        scale_s = jnp.where(gmask_s, 2.0, 1.0).astype(jnp.float32)
        off_s = jnp.where(gmask_s, -1.0, 0.0).astype(jnp.float32)

        lane_m = lax.broadcasted_iota(jnp.int32, (Bpad, Gm), 1)
        gmask_m = (lane_m >= 2 * Hm) & (lane_m < 3 * Hm)
        scale_m = jnp.where(gmask_m, 2.0, 1.0).astype(jnp.float32)
        off_m = jnp.where(gmask_m, -1.0, 0.0).astype(jnp.float32)

        # Contiguous bf16 carry [h_sub | h_master] (matmul operand).
        hc_scr[...] = jnp.zeros((Bpad, H2 + Hm), jnp.bfloat16)
        c_s = jnp.zeros((Bpad, H2), jnp.float32)   # [c_acous | c_visual]
        c_m = jnp.zeros((Bpad, Hm), jnp.float32)

        # S is small and static -> fully unrolled straight-line recurrence.
        # TODO(synk): for production sequence lengths switch to a time-chunked
        # grid ("arbitrary" axis, h/c carried in VMEM scratch via pl.when) to
        # bound VMEM and overlap the x/out DMA with compute.
        for t in range(S):
            r0 = t * Bpad                       # sublane-aligned (Bpad == 8)

            # --- stacked acous+visual LSTM cell: ONE (Bpad,2H)@(2H,8H) push.
            gates = xg_scr[r0:r0 + Bpad, :] + jnp.dot(
                hc_scr[:, 0:H2], whh_s, preferred_element_type=jnp.float32)
            act = jax.nn.sigmoid(gates * scale_s) * scale_s + off_s
            i_g = act[:, 0 * H2:1 * H2]
            f_g = act[:, 1 * H2:2 * H2]
            g_g = act[:, 2 * H2:3 * H2]
            o_g = act[:, 3 * H2:4 * H2]
            c_s = f_g * c_s + i_g * g_g
            h_s = o_g * jnp.tanh(c_s)
            hc_scr[:, 0:H2] = h_s.astype(jnp.bfloat16)

            # --- master LSTM cell.  Its input concat([h_a, h_v]) is exactly
            #     h_s, already sitting in the carry; its two matmuls are fused
            #     into ONE push against the packed [W_ih ; W_hh] weight.
            gm = (jnp.dot(hc_scr[...], w_m,
                          preferred_element_type=jnp.float32) + bm_b)
            actm = jax.nn.sigmoid(gm * scale_m) * scale_m + off_m
            i_m = actm[:, 0 * Hm:1 * Hm]
            f_m = actm[:, 1 * Hm:2 * Hm]
            g_m = actm[:, 2 * Hm:3 * Hm]
            o_m = actm[:, 3 * Hm:4 * Hm]
            c_m = f_m * c_m + i_m * g_m
            h_m = o_m * jnp.tanh(c_m)
            hc_scr[:, H2:H2 + Hm] = h_m.astype(jnp.bfloat16)

            hm_scr[r0:r0 + Bpad, :] = h_m       # aligned full-row store

        # ---- time-parallel output projection, lane-dense (padded to 128).
        y = (jnp.dot(hm_scr[...].astype(jnp.bfloat16), wout_ref[...],
                     preferred_element_type=jnp.float32) + bout_ref[...])
        out_ref[...] = jax.nn.sigmoid(y)

    return kernel


def _fused_forward_2d(kp, x2d, S, Bpad):
    """Single pallas_call running the whole model. Returns (S*Bpad, Ppad) f32."""
    SB, Fc = x2d.shape
    H2, G2 = kp["whh_sub"].shape
    Km, Gm = kp["w_m"].shape               # Km = 2H + Hm
    Hm, Ppad = kp["wout_pad"].shape

    def full(shape):
        return pl.BlockSpec(shape, lambda i: (0,) * len(shape))

    return pl.pallas_call(
        _make_fused_kernel(S, Bpad),
        out_shape=jax.ShapeDtypeStruct((SB, Ppad), jnp.float32),
        grid_spec=pltpu.PrefetchScalarGridSpec(
            num_scalar_prefetch=0,
            grid=(1,),
            in_specs=[
                full((SB, Fc)),
                full((Fc, G2)),
                full((H2, G2)),
                full((1, G2)),
                full((Km, Gm)),
                full((1, Gm)),
                full((Hm, Ppad)),
                full((1, Ppad)),
            ],
            out_specs=full((SB, Ppad)),
            scratch_shapes=[
                pltpu.VMEM((SB, G2), jnp.float32),     # staged input proj
                pltpu.VMEM((SB, Hm), jnp.float32),     # master hidden seq
                pltpu.VMEM((Bpad, Km), jnp.bfloat16),  # [h_sub | h_m] carry
            ],
        ),
        compiler_params=pltpu.CompilerParams(
            dimension_semantics=("arbitrary",)),
    )(x2d, kp["wih_cat"], kp["whh_sub"], kp["b_sub"],
      kp["w_m"], kp["b_m"], kp["wout_pad"], kp["bout_pad"])


@functools.partial(jax.jit, static_argnames=("pred_len",))
def lstm_predictor_forward(kernel_params, x_acous, i_acous, x_visual, i_visual,
                           *, pred_len):
    # i_acous / i_visual are the "irregular update" masks -- unused for the
    # regular (is_irregular=False) configuration, kept for signature parity.
    del i_acous, i_visual
    S, B, Fa = x_acous.shape
    Fv = x_visual.shape[2]
    Bpad = ((B + SUBLANE - 1) // SUBLANE) * SUBLANE
    # Fuse modalities on the feature axis; zero-pad batch to a sublane multiple
    # so every per-step tile inside the kernel is (8,128)-aligned.
    x_cat = jnp.concatenate([x_acous, x_visual], axis=2)       # (S, B, Fa+Fv)
    x_cat = jnp.pad(x_cat, ((0, 0), (0, Bpad - B), (0, 0)))    # (S, Bpad, Fc)
    x2d = x_cat.reshape(S * Bpad, Fa + Fv).astype(jnp.bfloat16)
    out2d = _fused_forward_2d(kernel_params, x2d, S, Bpad)
    Ppad = out2d.shape[1]
    return out2d.reshape(S, Bpad, Ppad)[:, :B, :pred_len]


# ---------------------------------------------------------------------------
# Parameter construction (PyTorch-layout random init -> kernel-packed layout)
# ---------------------------------------------------------------------------
def _raw_lstm(key, in_dim, hid):
    k1, k2, k3, k4 = jax.random.split(key, 4)
    w_ih = 0.1 * jax.random.normal(k1, (4 * hid, in_dim), jnp.float32)
    w_hh = 0.1 * jax.random.normal(k2, (4 * hid, hid), jnp.float32)
    b_ih = 0.1 * jax.random.normal(k3, (4 * hid,), jnp.float32)
    b_hh = 0.1 * jax.random.normal(k4, (4 * hid,), jnp.float32)
    return w_ih, w_hh, b_ih, b_hh


def init_params(key, feat_acous, feat_visual, hidden_sub, hidden_master,
                pred_len):
    """Returns (kernel_params, ref_params).

    The stacked-subnet kernel path assumes hidden_dims['acous'] ==
    hidden_dims['visual'] (true for this configuration)."""
    H = hidden_sub
    Hm = hidden_master
    ka, kv, km, ko1, ko2 = jax.random.split(key, 5)
    wih_a, whh_a, bia, bha = _raw_lstm(ka, feat_acous, H)
    wih_v, whh_v, biv, bhv = _raw_lstm(kv, feat_visual, H)
    wih_m, whh_m, bim, bhm = _raw_lstm(km, 2 * H, Hm)
    w_out = 0.1 * jax.random.normal(ko1, (pred_len, Hm), jnp.float32)
    b_out = 0.1 * jax.random.normal(ko2, (pred_len,), jnp.float32)

    # ---------- plain transposed params for the pure-JAX f32 reference
    ref = {
        "acous": dict(w_ih_t=wih_a.T, w_hh_t=whh_a.T, bias=bia + bha),
        "visual": dict(w_ih_t=wih_v.T, w_hh_t=whh_v.T, bias=biv + bhv),
        "master": dict(w_ih_t=wih_m.T, w_hh_t=whh_m.T, bias=bim + bhm),
        "out": dict(w_t=w_out.T, bias=b_out),
    }

    # ---------- kernel-packed params
    # Gate-interleaved columns for the stacked (acous|visual) cell:
    #   [i_a | i_v | f_a | f_v | g_a | g_v | o_a | o_v], each block width H.
    G2 = 8 * H

    def expand_ih(w_ih_t, mod):        # (F, 4H) -> (F, 8H); mod 0=acous,1=visual
        F = w_ih_t.shape[0]
        w = jnp.zeros((F, G2), jnp.float32)
        for k in range(4):
            lo = k * 2 * H + mod * H
            w = w.at[:, lo:lo + H].set(w_ih_t[:, k * H:(k + 1) * H])
        return w

    # Fused [acous ; visual] input-projection weight for the concatenated x.
    wih_cat = jnp.concatenate(
        [expand_ih(wih_a.T, 0), expand_ih(wih_v.T, 1)], axis=0)   # (Fa+Fv, 8H)

    whh_sub = jnp.zeros((2 * H, G2), jnp.float32)
    for k in range(4):
        whh_sub = whh_sub.at[0:H, k * 2 * H:k * 2 * H + H].set(
            whh_a.T[:, k * H:(k + 1) * H])
        whh_sub = whh_sub.at[H:2 * H, k * 2 * H + H:(k + 1) * 2 * H].set(
            whh_v.T[:, k * H:(k + 1) * H])

    b_a, b_v = bia + bha, biv + bhv
    b_sub = jnp.zeros((1, G2), jnp.float32)
    for k in range(4):
        b_sub = b_sub.at[0, k * 2 * H:k * 2 * H + H].set(b_a[k * H:(k + 1) * H])
        b_sub = b_sub.at[0, k * 2 * H + H:(k + 1) * 2 * H].set(
            b_v[k * H:(k + 1) * H])

    # Master: packed [W_ih ; W_hh] so the per-step master gates are ONE matmul
    # of the contiguous [h_sub | h_m] carry.
    w_m = jnp.concatenate([wih_m.T, whh_m.T], axis=0)           # (2H+Hm, 4Hm)

    # Lane-dense padded output projection (PRED_LEN -> next multiple of 128).
    out_pad = ((pred_len + 127) // 128) * 128
    wout_pad = jnp.zeros((Hm, out_pad), jnp.float32).at[:, :pred_len].set(w_out.T)
    bout_pad = jnp.zeros((1, out_pad), jnp.float32).at[0, :pred_len].set(b_out)

    bf16 = jnp.bfloat16
    kern = dict(
        wih_cat=wih_cat.astype(bf16),
        whh_sub=whh_sub.astype(bf16),
        b_sub=b_sub,
        w_m=w_m.astype(bf16),
        b_m=(bim + bhm).reshape(1, 4 * Hm),
        wout_pad=wout_pad.astype(bf16),
        bout_pad=bout_pad)
    return kern, ref


# ---------------------------------------------------------------------------
# Pure-JAX reference for verification (f32 throughout)
# ---------------------------------------------------------------------------
def _lstm_ref(x, w_ih_t, w_hh_t, bias):
    S, B, F = x.shape
    H = w_hh_t.shape[0]

    def step(carry, x_t):
        h, c = carry
        gates = x_t @ w_ih_t + h @ w_hh_t + bias
        i_g = jax.nn.sigmoid(gates[:, 0 * H:1 * H])
        f_g = jax.nn.sigmoid(gates[:, 1 * H:2 * H])
        g_g = jnp.tanh(gates[:, 2 * H:3 * H])
        o_g = jax.nn.sigmoid(gates[:, 3 * H:4 * H])
        c = f_g * c + i_g * g_g
        h = o_g * jnp.tanh(c)
        return (h, c), h

    init = (jnp.zeros((B, H), jnp.float32), jnp.zeros((B, H), jnp.float32))
    _, hs = lax.scan(step, init, x)
    return hs


def reference_forward(ref, x_acous, x_visual):
    h_a = _lstm_ref(x_acous, ref["acous"]["w_ih_t"],
                    ref["acous"]["w_hh_t"], ref["acous"]["bias"])
    h_v = _lstm_ref(x_visual, ref["visual"]["w_ih_t"],
                    ref["visual"]["w_hh_t"], ref["visual"]["bias"])
    m_in = jnp.concatenate([h_a, h_v], axis=2)
    lo = _lstm_ref(m_in, ref["master"]["w_ih_t"],
                   ref["master"]["w_hh_t"], ref["master"]["bias"])
    return jax.nn.sigmoid(lo @ ref["out"]["w_t"] + ref["out"]["bias"])


# ---------------------------------------------------------------------------
if __name__ == "__main__":
    SEQ = 8
    BATCH = 2
    FEAT_ACOUS = 16
    FEAT_VISUAL = 16
    HID_SUB = 32          # hidden_dims['acous'] == hidden_dims['visual']
    HID_MASTER = 32
    PRED_LEN = 60

    key = jax.random.PRNGKey(0)
    kp_key, kxa, kxv = jax.random.split(key, 3)
    kern_params, ref_params = init_params(
        kp_key, FEAT_ACOUS, FEAT_VISUAL, HID_SUB, HID_MASTER, PRED_LEN)

    x_acous = jax.random.normal(kxa, (SEQ, BATCH, FEAT_ACOUS), jnp.float32)
    x_visual = jax.random.normal(kxv, (SEQ, BATCH, FEAT_VISUAL), jnp.float32)
    i_acous = jnp.zeros((SEQ, BATCH), jnp.float32)    # unused (regular LSTMs)
    i_visual = jnp.zeros((SEQ, BATCH), jnp.float32)   # unused (regular LSTMs)

    out = lstm_predictor_forward(kern_params, x_acous, i_acous, x_visual,
                                 i_visual, pred_len=PRED_LEN)
    out = jax.block_until_ready(out)

    ref = reference_forward(ref_params, x_acous, x_visual)
    assert out.shape == (SEQ, BATCH, PRED_LEN), out.shape
    # bf16 matmul operands with f32 accumulation -> loosened tolerance vs the
    # all-f32 reference (observed error is ~1e-3 at these shapes).
    assert jnp.allclose(out, ref, atol=2e-2, rtol=2e-2), "mismatch vs reference"

    # TODO(synk): the irregular (nn.LSTMCell + data-dependent changed_indices)
    # and embedding_helper branches are not exercised by this configuration.
    print("KERNEL_OK")
</pallas_src>

<mosaic_0001>
module attributes {stable_mosaic.version = 11 : i64} {
  func.func @kernel(%arg0: i32, %arg1: memref<64x32xbf16, #tpu.memory_space<vmem>>, %arg2: memref<32x256xbf16, #tpu.memory_space<vmem>>, %arg3: memref<64x256xbf16, #tpu.memory_space<vmem>>, %arg4: memref<1x256xf32, #tpu.memory_space<vmem>>, %arg5: memref<96x128xbf16, #tpu.memory_space<vmem>>, %arg6: memref<1x128xf32, #tpu.memory_space<vmem>>, %arg7: memref<32x128xbf16, #tpu.memory_space<vmem>>, %arg8: memref<1x128xf32, #tpu.memory_space<vmem>>, %arg9: memref<64x128xf32, #tpu.memory_space<vmem>>, %arg10: memref<64x256xf32, #tpu.memory_space<vmem>>, %arg11: memref<64x32xf32, #tpu.memory_space<vmem>>, %arg12: memref<8x96xbf16, #tpu.memory_space<vmem>>) attributes {dimension_semantics = [#tpu.dimension_semantics<arbitrary>], iteration_bounds = array<i64: 1>, scalar_prefetch = 0 : i64, scratch_operands = 3 : i64, tpu.core_type = #tpu.core_type<tc>, window_params = [{pipeline_mode = #tpu.pipeline_mode<synchronous>, transform_indices = @transform_0, window_bounds = array<i64: 64, 32>}, {pipeline_mode = #tpu.pipeline_mode<synchronous>, transform_indices = @transform_1, window_bounds = array<i64: 32, 256>}, {pipeline_mode = #tpu.pipeline_mode<synchronous>, transform_indices = @transform_2, window_bounds = array<i64: 64, 256>}, {pipeline_mode = #tpu.pipeline_mode<synchronous>, transform_indices = @transform_3, window_bounds = array<i64: 1, 256>}, {pipeline_mode = #tpu.pipeline_mode<synchronous>, transform_indices = @transform_4, window_bounds = array<i64: 96, 128>}, {pipeline_mode = #tpu.pipeline_mode<synchronous>, transform_indices = @transform_5, window_bounds = array<i64: 1, 128>}, {pipeline_mode = #tpu.pipeline_mode<synchronous>, transform_indices = @transform_6, window_bounds = array<i64: 32, 128>}, {pipeline_mode = #tpu.pipeline_mode<synchronous>, transform_indices = @transform_7, window_bounds = array<i64: 1, 128>}, {pipeline_mode = #tpu.pipeline_mode<synchronous>, transform_indices = @transform_8, window_bounds = array<i64: 64, 128>}]} {
    %c0 = arith.constant 0 : index
    %c0_0 = arith.constant 0 : index
    %0 = vector.load %arg1[%c0, %c0_0] : memref<64x32xbf16, #tpu.memory_space<vmem>>, vector<64x32xbf16>
    %c0_1 = arith.constant 0 : index
    %c0_2 = arith.constant 0 : index
    %1 = vector.load %arg2[%c0_1, %c0_2] : memref<32x256xbf16, #tpu.memory_space<vmem>>, vector<32x256xbf16>
    %cst = arith.constant dense<0.000000e+00> : vector<64x256xf32>
    %2 = tpu.matmul %0, %1, %cst {dimension_numbers = #tpu.dot_dimension_numbers<[1], [0], [0], [1], [0, 0, 1, 1], [], []>} : vector<64x32xbf16>, vector<32x256xbf16>, vector<64x256xf32> -> vector<64x256xf32>
    %c0_3 = arith.constant 0 : index
    %c0_4 = arith.constant 0 : index
    %3 = vector.load %arg4[%c0_3, %c0_4] : memref<1x256xf32, #tpu.memory_space<vmem>>, vector<1x256xf32>
    %4 = vector.broadcast %3 : vector<1x256xf32> to vector<64x256xf32>
    %5 = arith.addf %2, %4 : vector<64x256xf32>
    %c0_5 = arith.constant 0 : index
    %c0_6 = arith.constant 0 : index
    %6 = vector.load %arg10[%c0_5, %c0_6] : memref<64x256xf32, #tpu.memory_space<vmem>>, vector<64x256xf32>
    tpu.vector_store %arg10[%c0_5, %c0_6], %5 {strides = array<i32>} : memref<64x256xf32, #tpu.memory_space<vmem>>, vector<64x256xf32>,
    %c0_7 = arith.constant 0 : index
    %c0_8 = arith.constant 0 : index
    %7 = vector.load %arg3[%c0_7, %c0_8] : memref<64x256xbf16, #tpu.memory_space<vmem>>, vector<64x256xbf16>
    %c0_9 = arith.constant 0 : index
    %c0_10 = arith.constant 0 : index
    %8 = vector.load %arg5[%c0_9, %c0_10] : memref<96x128xbf16, #tpu.memory_space<vmem>>, vector<96x128xbf16>
    %c0_11 = arith.constant 0 : index
    %c0_12 = arith.constant 0 : index
    %9 = vector.load %arg6[%c0_11, %c0_12] : memref<1x128xf32, #tpu.memory_space<vmem>>, vector<1x128xf32>
    %10 = vector.shape_cast %9 : vector<1x128xf32> to vector<1x128xf32>
    %11 = vector.broadcast %10 : vector<1x128xf32> to vector<8x128xf32>
    %12 = tpu.iota {dimensions = array<i32: 1>} : vector<8x256xi32>
    %c128_i32 = arith.constant 128 : i32
    %13 = vector.broadcast %c128_i32 : i32 to vector<8x256xi32>
    %14 = arith.cmpi sge, %12, %13 : vector<8x256xi32>
    %c192_i32 = arith.constant 192 : i32
    %15 = vector.broadcast %c192_i32 : i32 to vector<8x256xi32>
    %16 = arith.cmpi slt, %12, %15 : vector<8x256xi32>
    %17 = arith.andi %14, %16 : vector<8x256xi1>
    %cst_13 = arith.constant 2.000000e+00 : f32
    %cst_14 = arith.constant 1.000000e+00 : f32
    %18 = vector.broadcast %cst_13 : f32 to vector<8x256xf32>
    %19 = vector.broadcast %cst_14 : f32 to vector<8x256xf32>
    %20 = arith.select %17, %18, %19 : vector<8x256xi1>, vector<8x256xf32>
    %cst_15 = arith.constant -1.000000e+00 : f32
    %cst_16 = arith.constant 0.000000e+00 : f32
    %21 = vector.broadcast %cst_15 : f32 to vector<8x256xf32>
    %22 = vector.broadcast %cst_16 : f32 to vector<8x256xf32>
    %23 = arith.select %17, %21, %22 : vector<8x256xi1>, vector<8x256xf32>
    %24 = tpu.iota {dimensions = array<i32: 1>} : vector<8x128xi32>
    %c64_i32 = arith.constant 64 : i32
    %25 = vector.broadcast %c64_i32 : i32 to vector<8x128xi32>
    %26 = arith.cmpi sge, %24, %25 : vector<8x128xi32>
    %c96_i32 = arith.constant 96 : i32
    %27 = vector.broadcast %c96_i32 : i32 to vector<8x128xi32>
    %28 = arith.cmpi slt, %24, %27 : vector<8x128xi32>
    %29 = arith.andi %26, %28 : vector<8x128xi1>
    %cst_17 = arith.constant 2.000000e+00 : f32
    %cst_18 = arith.constant 1.000000e+00 : f32
    %30 = vector.broadcast %cst_17 : f32 to vector<8x128xf32>
    %31 = vector.broadcast %cst_18 : f32 to vector<8x128xf32>
    %32 = arith.select %29, %30, %31 : vector<8x128xi1>, vector<8x128xf32>
    %cst_19 = arith.constant -1.000000e+00 : f32
    %cst_20 = arith.constant 0.000000e+00 : f32
    %33 = vector.broadcast %cst_19 : f32 to vector<8x128xf32>
    %34 = vector.broadcast %cst_20 : f32 to vector<8x128xf32>
    %35 = arith.select %29, %33, %34 : vector<8x128xi1>, vector<8x128xf32>
    %cst_21 = arith.constant 0.000000e+00 : bf16
    %36 = vector.broadcast %cst_21 : bf16 to vector<8x96xbf16>
    %c0_22 = arith.constant 0 : index
    %c0_23 = arith.constant 0 : index
    %37 = vector.load %arg12[%c0_22, %c0_23] : memref<8x96xbf16, #tpu.memory_space<vmem>>, vector<8x96xbf16>
    tpu.vector_store %arg12[%c0_22, %c0_23], %36 {strides = array<i32>} : memref<8x96xbf16, #tpu.memory_space<vmem>>, vector<8x96xbf16>,
    %cst_24 = arith.constant 0.000000e+00 : f32
    %38 = vector.broadcast %cst_24 : f32 to vector<8x64xf32>
    %cst_25 = arith.constant 0.000000e+00 : f32
    %39 = vector.broadcast %cst_25 : f32 to vector<8x32xf32>
    %c0_26 = arith.constant 0 : index
    %c0_27 = arith.constant 0 : index
    %40 = vector.load %arg10[%c0_26, %c0_27] : memref<64x256xf32, #tpu.memory_space<vmem>>, vector<8x256xf32>
    %c0_28 = arith.constant 0 : index
    %c0_29 = arith.constant 0 : index
    %41 = vector.load %arg12[%c0_28, %c0_29] : memref<8x96xbf16, #tpu.memory_space<vmem>>, vector<8x64xbf16>
    %cst_30 = arith.constant dense<0.000000e+00> : vector<8x256xf32>
    %42 = tpu.matmul %41, %7, %cst_30 {dimension_numbers = #tpu.dot_dimension_numbers<[1], [0], [0], [1], [0, 0, 1, 1], [], []>} : vector<8x64xbf16>, vector<64x256xbf16>, vector<8x256xf32> -> vector<8x256xf32>
    %43 = arith.addf %40, %42 : vector<8x256xf32>
    %44 = arith.mulf %43, %20 : vector<8x256xf32>
    %45 = arith.negf %44 : vector<8x256xf32>
    %46 = math.exp %45 : vector<8x256xf32>
    %cst_31 = arith.constant 1.000000e+00 : f32
    %47 = vector.broadcast %cst_31 : f32 to vector<8x256xf32>
    %48 = arith.addf %47, %46 : vector<8x256xf32>
    %49 = arith.divf %47, %48 : vector<8x256xf32>
    %50 = arith.mulf %49, %20 : vector<8x256xf32>
    %51 = arith.addf %50, %23 : vector<8x256xf32>
    %52 = vector.extract_strided_slice %51 {offsets = [0, 0], sizes = [8, 64], strides = [1, 1]} : vector<8x256xf32> to vector<8x64xf32>
    %53 = vector.extract_strided_slice %51 {offsets = [0, 64], sizes = [8, 64], strides = [1, 1]} : vector<8x256xf32> to vector<8x64xf32>
    %54 = vector.extract_strided_slice %51 {offsets = [0, 128], sizes = [8, 64], strides = [1, 1]} : vector<8x256xf32> to vector<8x64xf32>
    %55 = vector.extract_strided_slice %51 {offsets = [0, 192], sizes = [8, 64], strides = [1, 1]} : vector<8x256xf32> to vector<8x64xf32>
    %56 = arith.mulf %53, %38 : vector<8x64xf32>
    %57 = arith.mulf %52, %54 : vector<8x64xf32>
    %58 = arith.addf %56, %57 : vector<8x64xf32>
    %59 = math.tanh %58 : vector<8x64xf32>
    %60 = arith.mulf %55, %59 : vector<8x64xf32>
    %61 = arith.truncf %60 : vector<8x64xf32> to vector<8x64xbf16>
    %c0_32 = arith.constant 0 : index
    %c0_33 = arith.constant 0 : index
    %62 = vector.load %arg12[%c0_32, %c0_33] : memref<8x96xbf16, #tpu.memory_space<vmem>>, vector<8x64xbf16>
    tpu.vector_store %arg12[%c0_32, %c0_33], %61 {strides = array<i32>} : memref<8x96xbf16, #tpu.memory_space<vmem>>, vector<8x64xbf16>,
    %c0_34 = arith.constant 0 : index
    %c0_35 = arith.constant 0 : index
    %63 = vector.load %arg12[%c0_34, %c0_35] : memref<8x96xbf16, #tpu.memory_space<vmem>>, vector<8x96xbf16>
    %cst_36 = arith.constant dense<0.000000e+00> : vector<8x128xf32>
    %64 = tpu.matmul %63, %8, %cst_36 {dimension_numbers = #tpu.dot_dimension_numbers<[1], [0], [0], [1], [0, 0, 1, 1], [], []>} : vector<8x96xbf16>, vector<96x128xbf16>, vector<8x128xf32> -> vector<8x128xf32>
    %65 = arith.addf %64, %11 : vector<8x128xf32>
    %66 = arith.mulf %65, %32 : vector<8x128xf32>
    %67 = arith.negf %66 : vector<8x128xf32>
    %68 = math.exp %67 : vector<8x128xf32>
    %cst_37 = arith.constant 1.000000e+00 : f32
    %69 = vector.broadcast %cst_37 : f32 to vector<8x128xf32>
    %70 = arith.addf %69, %68 : vector<8x128xf32>
    %71 = arith.divf %69, %70 : vector<8x128xf32>
    %72 = arith.mulf %71, %32 : vector<8x128xf32>
    %73 = arith.addf %72, %35 : vector<8x128xf32>
    %74 = vector.extract_strided_slice %73 {offsets = [0, 0], sizes = [8, 32], strides = [1, 1]} : vector<8x128xf32> to vector<8x32xf32>
    %75 = vector.extract_strided_slice %73 {offsets = [0, 32], sizes = [8, 32], strides = [1, 1]} : vector<8x128xf32> to vector<8x32xf32>
    %76 = vector.extract_strided_slice %73 {offsets = [0, 64], sizes = [8, 32], strides = [1, 1]} : vector<8x128xf32> to vector<8x32xf32>
    %77 = vector.extract_strided_slice %73 {offsets = [0, 96], sizes = [8, 32], strides = [1, 1]} : vector<8x128xf32> to vector<8x32xf32>
    %78 = arith.mulf %75, %39 : vector<8x32xf32>
    %79 = arith.mulf %74, %76 : vector<8x32xf32>
    %80 = arith.addf %78, %79 : vector<8x32xf32>
    %81 = math.tanh %80 : vector<8x32xf32>
    %82 = arith.mulf %77, %81 : vector<8x32xf32>
    %83 = arith.truncf %82 : vector<8x32xf32> to vector<8x32xbf16>
    %c0_38 = arith.constant 0 : index
    %c64 = arith.constant 64 : index
    %84 = vector.load %arg12[%c0_38, %c64] : memref<8x96xbf16, #tpu.memory_space<vmem>>, vector<8x32xbf16>
    tpu.vector_store %arg12[%c0_38, %c64], %83 {strides = array<i32>} : memref<8x96xbf16, #tpu.memory_space<vmem>>, vector<8x32xbf16>,
    %c0_39 = arith.constant 0 : index
    %c0_40 = arith.constant 0 : index
    %85 = vector.load %arg11[%c0_39, %c0_40] : memref<64x32xf32, #tpu.memory_space<vmem>>, vector<8x32xf32>
    tpu.vector_store %arg11[%c0_39, %c0_40], %82 {strides = array<i32>} : memref<64x32xf32, #tpu.memory_space<vmem>>, vector<8x32xf32>,
    %c8 = arith.constant 8 : index
    %c0_41 = arith.constant 0 : index
    %86 = vector.load %arg10[%c8, %c0_41] : memref<64x256xf32, #tpu.memory_space<vmem>>, vector<8x256xf32>
    %c0_42 = arith.constant 0 : index
    %c0_43 = arith.constant 0 : index
    %87 = vector.load %arg12[%c0_42, %c0_43] : memref<8x96xbf16, #tpu.memory_space<vmem>>, vector<8x64xbf16>
    %cst_44 = arith.constant dense<0.000000e+00> : vector<8x256xf32>
    %88 = tpu.matmul %87, %7, %cst_44 {dimension_numbers = #tpu.dot_dimension_numbers<[1], [0], [0], [1], [0, 0, 1, 1], [], []>} : vector<8x64xbf16>, vector<64x256xbf16>, vector<8x256xf32> -> vector<8x256xf32>
    %89 = arith.addf %86, %88 : vector<8x256xf32>
    %90 = arith.mulf %89, %20 : vector<8x256xf32>
    %91 = arith.negf %90 : vector<8x256xf32>
    %92 = math.exp %91 : vector<8x256xf32>
    %cst_45 = arith.constant 1.000000e+00 : f32
    %93 = vector.broadcast %cst_45 : f32 to vector<8x256xf32>
    %94 = arith.addf %93, %92 : vector<8x256xf32>
    %95 = arith.divf %93, %94 : vector<8x256xf32>
    %96 = arith.mulf %95, %20 : vector<8x256xf32>
    %97 = arith.addf %96, %23 : vector<8x256xf32>
    %98 = vector.extract_strided_slice %97 {offsets = [0, 0], sizes = [8, 64], strides = [1, 1]} : vector<8x256xf32> to vector<8x64xf32>
    %99 = vector.extract_strided_slice %97 {offsets = [0, 64], sizes = [8, 64], strides = [1, 1]} : vector<8x256xf32> to vector<8x64xf32>
    %100 = vector.extract_strided_slice %97 {offsets = [0, 128], sizes = [8, 64], strides = [1, 1]} : vector<8x256xf32> to vector<8x64xf32>
    %101 = vector.extract_strided_slice %97 {offsets = [0, 192], sizes = [8, 64], strides = [1, 1]} : vector<8x256xf32> to vector<8x64xf32>
    %102 = arith.mulf %99, %58 : vector<8x64xf32>
    %103 = arith.mulf %98, %100 : vector<8x64xf32>
    %104 = arith.addf %102, %103 : vector<8x64xf32>
    %105 = math.tanh %104 : vector<8x64xf32>
    %106 = arith.mulf %101, %105 : vector<8x64xf32>
    %107 = arith.truncf %106 : vector<8x64xf32> to vector<8x64xbf16>
    %c0_46 = arith.constant 0 : index
    %c0_47 = arith.constant 0 : index
    %108 = vector.load %arg12[%c0_46, %c0_47] : memref<8x96xbf16, #tpu.memory_space<vmem>>, vector<8x64xbf16>
    tpu.vector_store %arg12[%c0_46, %c0_47], %107 {strides = array<i32>} : memref<8x96xbf16, #tpu.memory_space<vmem>>, vector<8x64xbf16>,
    %c0_48 = arith.constant 0 : index
    %c0_49 = arith.constant 0 : index
    %109 = vector.load %arg12[%c0_48, %c0_49] : memref<8x96xbf16, #tpu.memory_space<vmem>>, vector<8x96xbf16>
    %cst_50 = arith.constant dense<0.000000e+00> : vector<8x128xf32>
    %110 = tpu.matmul %109, %8, %cst_50 {dimension_numbers = #tpu.dot_dimension_numbers<[1], [0], [0], [1], [0, 0, 1, 1], [], []>} : vector<8x96xbf16>, vector<96x128xbf16>, vector<8x128xf32> -> vector<8x128xf32>
    %111 = arith.addf %110, %11 : vector<8x128xf32>
    %112 = arith.mulf %111, %32 : vector<8x128xf32>
    %113 = arith.negf %112 : vector<8x128xf32>
    %114 = math.exp %113 : vector<8x128xf32>
    %cst_51 = arith.constant 1.000000e+00 : f32
    %115 = vector.broadcast %cst_51 : f32 to vector<8x128xf32>
    %116 = arith.addf %115, %114 : vector<8x128xf32>
    %117 = arith.divf %115, %116 : vector<8x128xf32>
    %118 = arith.mulf %117, %32 : vector<8x128xf32>
    %119 = arith.addf %118, %35 : vector<8x128xf32>
    %120 = vector.extract_strided_slice %119 {offsets = [0, 0], sizes = [8, 32], strides = [1, 1]} : vector<8x128xf32> to vector<8x32xf32>
    %121 = vector.extract_strided_slice %119 {offsets = [0, 32], sizes = [8, 32], strides = [1, 1]} : vector<8x128xf32> to vector<8x32xf32>
    %122 = vector.extract_strided_slice %119 {offsets = [0, 64], sizes = [8, 32], strides = [1, 1]} : vector<8x128xf32> to vector<8x32xf32>
    %123 = vector.extract_strided_slice %119 {offsets = [0, 96], sizes = [8, 32], strides = [1, 1]} : vector<8x128xf32> to vector<8x32xf32>
    %124 = arith.mulf %121, %80 : vector<8x32xf32>
    %125 = arith.mulf %120, %122 : vector<8x32xf32>
    %126 = arith.addf %124, %125 : vector<8x32xf32>
    %127 = math.tanh %126 : vector<8x32xf32>
    %128 = arith.mulf %123, %127 : vector<8x32xf32>
    %129 = arith.truncf %128 : vector<8x32xf32> to vector<8x32xbf16>
    %c0_52 = arith.constant 0 : index
    %c64_53 = arith.constant 64 : index
    %130 = vector.load %arg12[%c0_52, %c64_53] : memref<8x96xbf16, #tpu.memory_space<vmem>>, vector<8x32xbf16>
    tpu.vector_store %arg12[%c0_52, %c64_53], %129 {strides = array<i32>} : memref<8x96xbf16, #tpu.memory_space<vmem>>, vector<8x32xbf16>,
    %c8_54 = arith.constant 8 : index
    %c0_55 = arith.constant 0 : index
    %131 = vector.load %arg11[%c8_54, %c0_55] : memref<64x32xf32, #tpu.memory_space<vmem>>, vector<8x32xf32>
    tpu.vector_store %arg11[%c8_54, %c0_55], %128 {strides = array<i32>} : memref<64x32xf32, #tpu.memory_space<vmem>>, vector<8x32xf32>,
    %c16 = arith.constant 16 : index
    %c0_56 = arith.constant 0 : index
    %132 = vector.load %arg10[%c16, %c0_56] : memref<64x256xf32, #tpu.memory_space<vmem>>, vector<8x256xf32>
    %c0_57 = arith.constant 0 : index
    %c0_58 = arith.constant 0 : index
    %133 = vector.load %arg12[%c0_57, %c0_58] : memref<8x96xbf16, #tpu.memory_space<vmem>>, vector<8x64xbf16>
    %cst_59 = arith.constant dense<0.000000e+00> : vector<8x256xf32>
    %134 = tpu.matmul %133, %7, %cst_59 {dimension_numbers = #tpu.dot_dimension_numbers<[1], [0], [0], [1], [0, 0, 1, 1], [], []>} : vector<8x64xbf16>, vector<64x256xbf16>, vector<8x256xf32> -> vector<8x256xf32>
    %135 = arith.addf %132, %134 : vector<8x256xf32>
    %136 = arith.mulf %135, %20 : vector<8x256xf32>
    %137 = arith.negf %136 : vector<8x256xf32>
    %138 = math.exp %137 : vector<8x256xf32>
    %cst_60 = arith.constant 1.000000e+00 : f32
    %139 = vector.broadcast %cst_60 : f32 to vector<8x256xf32>
    %140 = arith.addf %139, %138 : vector<8x256xf32>
    %141 = arith.divf %139, %140 : vector<8x256xf32>
    %142 = arith.mulf %141, %20 : vector<8x256xf32>
    %143 = arith.addf %142, %23 : vector<8x256xf32>
    %144 = vector.extract_strided_slice %143 {offsets = [0, 0], sizes = [8, 64], strides = [1, 1]} : vector<8x256xf32> to vector<8x64xf32>
    %145 = vector.extract_strided_slice %143 {offsets = [0, 64], sizes = [8, 64], strides = [1, 1]} : vector<8x256xf32> to vector<8x64xf32>
    %146 = vector.extract_strided_slice %143 {offsets = [0, 128], sizes = [8, 64], strides = [1, 1]} : vector<8x256xf32> to vector<8x64xf32>
    %147 = vector.extract_strided_slice %143 {offsets = [0, 192], sizes = [8, 64], strides = [1, 1]} : vector<8x256xf32> to vector<8x64xf32>
    %148 = arith.mulf %145, %104 : vector<8x64xf32>
    %149 = arith.mulf %144, %146 : vector<8x64xf32>
    %150 = arith.addf %148, %149 : vector<8x64xf32>
    %151 = math.tanh %150 : vector<8x64xf32>
    %152 = arith.mulf %147, %151 : vector<8x64xf32>
    %153 = arith.truncf %152 : vector<8x64xf32> to vector<8x64xbf16>
    %c0_61 = arith.constant 0 : index
    %c0_62 = arith.constant 0 : index
    %154 = vector.load %arg12[%c0_61, %c0_62] : memref<8x96xbf16, #tpu.memory_space<vmem>>, vector<8x64xbf16>
    tpu.vector_store %arg12[%c0_61, %c0_62], %153 {strides = array<i32>} : memref<8x96xbf16, #tpu.memory_space<vmem>>, vector<8x64xbf16>,
    %c0_63 = arith.constant 0 : index
    %c0_64 = arith.constant 0 : index
    %155 = vector.load %arg12[%c0_63, %c0_64] : memref<8x96xbf16, #tpu.memory_space<vmem>>, vector<8x96xbf16>
    %cst_65 = arith.constant dense<0.000000e+00> : vector<8x128xf32>
    %156 = tpu.matmul %155, %8, %cst_65 {dimension_numbers = #tpu.dot_dimension_numbers<[1], [0], [0], [1], [0, 0, 1, 1], [], []>} : vector<8x96xbf16>, vector<96x128xbf16>, vector<8x128xf32> -> vector<8x128xf32>
    %157 = arith.addf %156, %11 : vector<8x128xf32>
    %158 = arith.mulf %157, %32 : vector<8x128xf32>
    %159 = arith.negf %158 : vector<8x128xf32>
    %160 = math.exp %159 : vector<8x128xf32>
    %cst_66 = arith.constant 1.000000e+00 : f32
    %161 = vector.broadcast %cst_66 : f32 to vector<8x128xf32>
    %162 = arith.addf %161, %160 : vector<8x128xf32>
    %163 = arith.divf %161, %162 : vector<8x128xf32>
    %164 = arith.mulf %163, %32 : vector<8x128xf32>
    %165 = arith.addf %164, %35 : vector<8x128xf32>
    %166 = vector.extract_strided_slice %165 {offsets = [0, 0], sizes = [8, 32], strides = [1, 1]} : vector<8x128xf32> to vector<8x32xf32>
    %167 = vector.extract_strided_slice %165 {offsets = [0, 32], sizes = [8, 32], strides = [1, 1]} : vector<8x128xf32> to vector<8x32xf32>
    %168 = vector.extract_strided_slice %165 {offsets = [0, 64], sizes = [8, 32], strides = [1, 1]} : vector<8x128xf32> to vector<8x32xf32>
    %169 = vector.extract_strided_slice %165 {offsets = [0, 96], sizes = [8, 32], strides = [1, 1]} : vector<8x128xf32> to vector<8x32xf32>
    %170 = arith.mulf %167, %126 : vector<8x32xf32>
    %171 = arith.mulf %166, %168 : vector<8x32xf32>
    %172 = arith.addf %170, %171 : vector<8x32xf32>
    %173 = math.tanh %172 : vector<8x32xf32>
    %174 = arith.mulf %169, %173 : vector<8x32xf32>
    %175 = arith.truncf %174 : vector<8x32xf32> to vector<8x32xbf16>
    %c0_67 = arith.constant 0 : index
    %c64_68 = arith.constant 64 : index
    %176 = vector.load %arg12[%c0_67, %c64_68] : memref<8x96xbf16, #tpu.memory_space<vmem>>, vector<8x32xbf16>
    tpu.vector_store %arg12[%c0_67, %c64_68], %175 {strides = array<i32>} : memref<8x96xbf16, #tpu.memory_space<vmem>>, vector<8x32xbf16>,
    %c16_69 = arith.constant 16 : index
    %c0_70 = arith.constant 0 : index
    %177 = vector.load %arg11[%c16_69, %c0_70] : memref<64x32xf32, #tpu.memory_space<vmem>>, vector<8x32xf32>
    tpu.vector_store %arg11[%c16_69, %c0_70], %174 {strides = array<i32>} : memref<64x32xf32, #tpu.memory_space<vmem>>, vector<8x32xf32>,
    %c24 = arith.constant 24 : index
    %c0_71 = arith.constant 0 : index
    %178 = vector.load %arg10[%c24, %c0_71] : memref<64x256xf32, #tpu.memory_space<vmem>>, vector<8x256xf32>
    %c0_72 = arith.constant 0 : index
    %c0_73 = arith.constant 0 : index
    %179 = vector.load %arg12[%c0_72, %c0_73] : memref<8x96xbf16, #tpu.memory_space<vmem>>, vector<8x64xbf16>
    %cst_74 = arith.constant dense<0.000000e+00> : vector<8x256xf32>
    %180 = tpu.matmul %179, %7, %cst_74 {dimension_numbers = #tpu.dot_dimension_numbers<[1], [0], [0], [1], [0, 0, 1, 1], [], []>} : vector<8x64xbf16>, vector<64x256xbf16>, vector<8x256xf32> -> vector<8x256xf32>
    %181 = arith.addf %178, %180 : vector<8x256xf32>
    %182 = arith.mulf %181, %20 : vector<8x256xf32>
    %183 = arith.negf %182 : vector<8x256xf32>
    %184 = math.exp %183 : vector<8x256xf32>
    %cst_75 = arith.constant 1.000000e+00 : f32
    %185 = vector.broadcast %cst_75 : f32 to vector<8x256xf32>
    %186 = arith.addf %185, %184 : vector<8x256xf32>
    %187 = arith.divf %185, %186 : vector<8x256xf32>
    %188 = arith.mulf %187, %20 : vector<8x256xf32>
    %189 = arith.addf %188, %23 : vector<8x256xf32>
    %190 = vector.extract_strided_slice %189 {offsets = [0, 0], sizes = [8, 64], strides = [1, 1]} : vector<8x256xf32> to vector<8x64xf32>
    %191 = vector.extract_strided_slice %189 {offsets = [0, 64], sizes = [8, 64], strides = [1, 1]} : vector<8x256xf32> to vector<8x64xf32>
    %192 = vector.extract_strided_slice %189 {offsets = [0, 128], sizes = [8, 64], strides = [1, 1]} : vector<8x256xf32> to vector<8x64xf32>
    %193 = vector.extract_strided_slice %189 {offsets = [0, 192], sizes = [8, 64], strides = [1, 1]} : vector<8x256xf32> to vector<8x64xf32>
    %194 = arith.mulf %191, %150 : vector<8x64xf32>
    %195 = arith.mulf %190, %192 : vector<8x64xf32>
    %196 = arith.addf %194, %195 : vector<8x64xf32>
    %197 = math.tanh %196 : vector<8x64xf32>
    %198 = arith.mulf %193, %197 : vector<8x64xf32>
    %199 = arith.truncf %198 : vector<8x64xf32> to vector<8x64xbf16>
    %c0_76 = arith.constant 0 : index
    %c0_77 = arith.constant 0 : index
    %200 = vector.load %arg12[%c0_76, %c0_77] : memref<8x96xbf16, #tpu.memory_space<vmem>>, vector<8x64xbf16>
    tpu.vector_store %arg12[%c0_76, %c0_77], %199 {strides = array<i32>} : memref<8x96xbf16, #tpu.memory_space<vmem>>, vector<8x64xbf16>,
    %c0_78 = arith.constant 0 : index
    %c0_79 = arith.constant 0 : index
    %201 = vector.load %arg12[%c0_78, %c0_79] : memref<8x96xbf16, #tpu.memory_space<vmem>>, vector<8x96xbf16>
    %cst_80 = arith.constant dense<0.000000e+00> : vector<8x128xf32>
    %202 = tpu.matmul %201, %8, %cst_80 {dimension_numbers = #tpu.dot_dimension_numbers<[1], [0], [0], [1], [0, 0, 1, 1], [], []>} : vector<8x96xbf16>, vector<96x128xbf16>, vector<8x128xf32> -> vector<8x128xf32>
    %203 = arith.addf %202, %11 : vector<8x128xf32>
    %204 = arith.mulf %203, %32 : vector<8x128xf32>
    %205 = arith.negf %204 : vector<8x128xf32>
    %206 = math.exp %205 : vector<8x128xf32>
    %cst_81 = arith.constant 1.000000e+00 : f32
    %207 = vector.broadcast %cst_81 : f32 to vector<8x128xf32>
    %208 = arith.addf %207, %206 : vector<8x128xf32>
    %209 = arith.divf %207, %208 : vector<8x128xf32>
    %210 = arith.mulf %209, %32 : vector<8x128xf32>
    %211 = arith.addf %210, %35 : vector<8x128xf32>
    %212 = vector.extract_strided_slice %211 {offsets = [0, 0], sizes = [8, 32], strides = [1, 1]} : vector<8x128xf32> to vector<8x32xf32>
    %213 = vector.extract_strided_slice %211 {offsets = [0, 32], sizes = [8, 32], strides = [1, 1]} : vector<8x128xf32> to vector<8x32xf32>
    %214 = vector.extract_strided_slice %211 {offsets = [0, 64], sizes = [8, 32], strides = [1, 1]} : vector<8x128xf32> to vector<8x32xf32>
    %215 = vector.extract_strided_slice %211 {offsets = [0, 96], sizes = [8, 32], strides = [1, 1]} : vector<8x128xf32> to vector<8x32xf32>
    %216 = arith.mulf %213, %172 : vector<8x32xf32>
    %217 = arith.mulf %212, %214 : vector<8x32xf32>
    %218 = arith.addf %216, %217 : vector<8x32xf32>
    %219 = math.tanh %218 : vector<8x32xf32>
    %220 = arith.mulf %215, %219 : vector<8x32xf32>
    %221 = arith.truncf %220 : vector<8x32xf32> to vector<8x32xbf16>
    %c0_82 = arith.constant 0 : index
    %c64_83 = arith.constant 64 : index
    %222 = vector.load %arg12[%c0_82, %c64_83] : memref<8x96xbf16, #tpu.memory_space<vmem>>, vector<8x32xbf16>
    tpu.vector_store %arg12[%c0_82, %c64_83], %221 {strides = array<i32>} : memref<8x96xbf16, #tpu.memory_space<vmem>>, vector<8x32xbf16>,
    %c24_84 = arith.constant 24 : index
    %c0_85 = arith.constant 0 : index
    %223 = vector.load %arg11[%c24_84, %c0_85] : memref<64x32xf32, #tpu.memory_space<vmem>>, vector<8x32xf32>
    tpu.vector_store %arg11[%c24_84, %c0_85], %220 {strides = array<i32>} : memref<64x32xf32, #tpu.memory_space<vmem>>, vector<8x32xf32>,
    %c32 = arith.constant 32 : index
    %c0_86 = arith.constant 0 : index
    %224 = vector.load %arg10[%c32, %c0_86] : memref<64x256xf32, #tpu.memory_space<vmem>>, vector<8x256xf32>
    %c0_87 = arith.constant 0 : index
    %c0_88 = arith.constant 0 : index
    %225 = vector.load %arg12[%c0_87, %c0_88] : memref<8x96xbf16, #tpu.memory_space<vmem>>, vector<8x64xbf16>
    %cst_89 = arith.constant dense<0.000000e+00> : vector<8x256xf32>
    %226 = tpu.matmul %225, %7, %cst_89 {dimension_numbers = #tpu.dot_dimension_numbers<[1], [0], [0], [1], [0, 0, 1, 1], [], []>} : vector<8x64xbf16>, vector<64x256xbf16>, vector<8x256xf32> -> vector<8x256xf32>
    %227 = arith.addf %224, %226 : vector<8x256xf32>
    %228 = arith.mulf %227, %20 : vector<8x256xf32>
    %229 = arith.negf %228 : vector<8x256xf32>
    %230 = math.exp %229 : vector<8x256xf32>
    %cst_90 = arith.constant 1.000000e+00 : f32
    %231 = vector.broadcast %cst_90 : f32 to vector<8x256xf32>
    %232 = arith.addf %231, %230 : vector<8x256xf32>
    %233 = arith.divf %231, %232 : vector<8x256xf32>
    %234 = arith.mulf %233, %20 : vector<8x256xf32>
    %235 = arith.addf %234, %23 : vector<8x256xf32>
    %236 = vector.extract_strided_slice %235 {offsets = [0, 0], sizes = [8, 64], strides = [1, 1]} : vector<8x256xf32> to vector<8x64xf32>
    %237 = vector.extract_strided_slice %235 {offsets = [0, 64], sizes = [8, 64], strides = [1, 1]} : vector<8x256xf32> to vector<8x64xf32>
    %238 = vector.extract_strided_slice %235 {offsets = [0, 128], sizes = [8, 64], strides = [1, 1]} : vector<8x256xf32> to vector<8x64xf32>
    %239 = vector.extract_strided_slice %235 {offsets = [0, 192], sizes = [8, 64], strides = [1, 1]} : vector<8x256xf32> to vector<8x64xf32>
    %240 = arith.mulf %237, %196 : vector<8x64xf32>
    %241 = arith.mulf %236, %238 : vector<8x64xf32>
    %242 = arith.addf %240, %241 : vector<8x64xf32>
    %243 = math.tanh %242 : vector<8x64xf32>
    %244 = arith.mulf %239, %243 : vector<8x64xf32>
    %245 = arith.truncf %244 : vector<8x64xf32> to vector<8x64xbf16>
    %c0_91 = arith.constant 0 : index
    %c0_92 = arith.constant 0 : index
    %246 = vector.load %arg12[%c0_91, %c0_92] : memref<8x96xbf16, #tpu.memory_space<vmem>>, vector<8x64xbf16>
    tpu.vector_store %arg12[%c0_91, %c0_92], %245 {strides = array<i32>} : memref<8x96xbf16, #tpu.memory_space<vmem>>, vector<8x64xbf16>,
    %c0_93 = arith.constant 0 : index
    %c0_94 = arith.constant 0 : index
    %247 = vector.load %arg12[%c0_93, %c0_94] : memref<8x96xbf16, #tpu.memory_space<vmem>>, vector<8x96xbf16>
    %cst_95 = arith.constant dense<0.000000e+00> : vector<8x128xf32>
    %248 = tpu.matmul %247, %8, %cst_95 {dimension_numbers = #tpu.dot_dimension_numbers<[1], [0], [0], [1], [0, 0, 1, 1], [], []>} : vector<8x96xbf16>, vector<96x128xbf16>, vector<8x128xf32> -> vector<8x128xf32>
    %249 = arith.addf %248, %11 : vector<8x128xf32>
    %250 = arith.mulf %249, %32 : vector<8x128xf32>
    %251 = arith.negf %250 : vector<8x128xf32>
    %252 = math.exp %251 : vector<8x128xf32>
    %cst_96 = arith.constant 1.000000e+00 : f32
    %253 = vector.broadcast %cst_96 : f32 to vector<8x128xf32>
    %254 = arith.addf %253, %252 : vector<8x128xf32>
    %255 = arith.divf %253, %254 : vector<8x128xf32>
    %256 = arith.mulf %255, %32 : vector<8x128xf32>
    %257 = arith.addf %256, %35 : vector<8x128xf32>
    %258 = vector.extract_strided_slice %257 {offsets = [0, 0], sizes = [8, 32], strides = [1, 1]} : vector<8x128xf32> to vector<8x32xf32>
    %259 = vector.extract_strided_slice %257 {offsets = [0, 32], sizes = [8, 32], strides = [1, 1]} : vector<8x128xf32> to vector<8x32xf32>
    %260 = vector.extract_strided_slice %257 {offsets = [0, 64], sizes = [8, 32], strides = [1, 1]} : vector<8x128xf32> to vector<8x32xf32>
    %261 = vector.extract_strided_slice %257 {offsets = [0, 96], sizes = [8, 32], strides = [1, 1]} : vector<8x128xf32> to vector<8x32xf32>
    %262 = arith.mulf %259, %218 : vector<8x32xf32>
    %263 = arith.mulf %258, %260 : vector<8x32xf32>
    %264 = arith.addf %262, %263 : vector<8x32xf32>
    %265 = math.tanh %264 : vector<8x32xf32>
    %266 = arith.mulf %261, %265 : vector<8x32xf32>
    %267 = arith.truncf %266 : vector<8x32xf32> to vector<8x32xbf16>
    %c0_97 = arith.constant 0 : index
    %c64_98 = arith.constant 64 : index
    %268 = vector.load %arg12[%c0_97, %c64_98] : memref<8x96xbf16, #tpu.memory_space<vmem>>, vector<8x32xbf16>
    tpu.vector_store %arg12[%c0_97, %c64_98], %267 {strides = array<i32>} : memref<8x96xbf16, #tpu.memory_space<vmem>>, vector<8x32xbf16>,
    %c32_99 = arith.constant 32 : index
    %c0_100 = arith.constant 0 : index
    %269 = vector.load %arg11[%c32_99, %c0_100] : memref<64x32xf32, #tpu.memory_space<vmem>>, vector<8x32xf32>
    tpu.vector_store %arg11[%c32_99, %c0_100], %266 {strides = array<i32>} : memref<64x32xf32, #tpu.memory_space<vmem>>, vector<8x32xf32>,
    %c40 = arith.constant 40 : index
    %c0_101 = arith.constant 0 : index
    %270 = vector.load %arg10[%c40, %c0_101] : memref<64x256xf32, #tpu.memory_space<vmem>>, vector<8x256xf32>
    %c0_102 = arith.constant 0 : index
    %c0_103 = arith.constant 0 : index
    %271 = vector.load %arg12[%c0_102, %c0_103] : memref<8x96xbf16, #tpu.memory_space<vmem>>, vector<8x64xbf16>
    %cst_104 = arith.constant dense<0.000000e+00> : vector<8x256xf32>
    %272 = tpu.matmul %271, %7, %cst_104 {dimension_numbers = #tpu.dot_dimension_numbers<[1], [0], [0], [1], [0, 0, 1, 1], [], []>} : vector<8x64xbf16>, vector<64x256xbf16>, vector<8x256xf32> -> vector<8x256xf32>
    %273 = arith.addf %270, %272 : vector<8x256xf32>
    %274 = arith.mulf %273, %20 : vector<8x256xf32>
    %275 = arith.negf %274 : vector<8x256xf32>
    %276 = math.exp %275 : vector<8x256xf32>
    %cst_105 = arith.constant 1.000000e+00 : f32
    %277 = vector.broadcast %cst_105 : f32 to vector<8x256xf32>
    %278 = arith.addf %277, %276 : vector<8x256xf32>
    %279 = arith.divf %277, %278 : vector<8x256xf32>
    %280 = arith.mulf %279, %20 : vector<8x256xf32>
    %281 = arith.addf %280, %23 : vector<8x256xf32>
    %282 = vector.extract_strided_slice %281 {offsets = [0, 0], sizes = [8, 64], strides = [1, 1]} : vector<8x256xf32> to vector<8x64xf32>
    %283 = vector.extract_strided_slice %281 {offsets = [0, 64], sizes = [8, 64], strides = [1, 1]} : vector<8x256xf32> to vector<8x64xf32>
    %284 = vector.extract_strided_slice %281 {offsets = [0, 128], sizes = [8, 64], strides = [1, 1]} : vector<8x256xf32> to vector<8x64xf32>
    %285 = vector.extract_strided_slice %281 {offsets = [0, 192], sizes = [8, 64], strides = [1, 1]} : vector<8x256xf32> to vector<8x64xf32>
    %286 = arith.mulf %283, %242 : vector<8x64xf32>
    %287 = arith.mulf %282, %284 : vector<8x64xf32>
    %288 = arith.addf %286, %287 : vector<8x64xf32>
    %289 = math.tanh %288 : vector<8x64xf32>
    %290 = arith.mulf %285, %289 : vector<8x64xf32>
    %291 = arith.truncf %290 : vector<8x64xf32> to vector<8x64xbf16>
    %c0_106 = arith.constant 0 : index
    %c0_107 = arith.constant 0 : index
    %292 = vector.load %arg12[%c0_106, %c0_107] : memref<8x96xbf16, #tpu.memory_space<vmem>>, vector<8x64xbf16>
    tpu.vector_store %arg12[%c0_106, %c0_107], %291 {strides = array<i32>} : memref<8x96xbf16, #tpu.memory_space<vmem>>, vector<8x64xbf16>,
    %c0_108 = arith.constant 0 : index
    %c0_109 = arith.constant 0 : index
    %293 = vector.load %arg12[%c0_108, %c0_109] : memref<8x96xbf16, #tpu.memory_space<vmem>>, vector<8x96xbf16>
    %cst_110 = arith.constant dense<0.000000e+00> : vector<8x128xf32>
    %294 = tpu.matmul %293, %8, %cst_110 {dimension_numbers = #tpu.dot_dimension_numbers<[1], [0], [0], [1], [0, 0, 1, 1], [], []>} : vector<8x96xbf16>, vector<96x128xbf16>, vector<8x128xf32> -> vector<8x128xf32>
    %295 = arith.addf %294, %11 : vector<8x128xf32>
    %296 = arith.mulf %295, %32 : vector<8x128xf32>
    %297 = arith.negf %296 : vector<8x128xf32>
    %298 = math.exp %297 : vector<8x128xf32>
    %cst_111 = arith.constant 1.000000e+00 : f32
    %299 = vector.broadcast %cst_111 : f32 to vector<8x128xf32>
    %300 = arith.addf %299, %298 : vector<8x128xf32>
    %301 = arith.divf %299, %300 : vector<8x128xf32>
    %302 = arith.mulf %301, %32 : vector<8x128xf32>
    %303 = arith.addf %302, %35 : vector<8x128xf32>
    %304 = vector.extract_strided_slice %303 {offsets = [0, 0], sizes = [8, 32], strides = [1, 1]} : vector<8x128xf32> to vector<8x32xf32>
    %305 = vector.extract_strided_slice %303 {offsets = [0, 32], sizes = [8, 32], strides = [1, 1]} : vector<8x128xf32> to vector<8x32xf32>
    %306 = vector.extract_strided_slice %303 {offsets = [0, 64], sizes = [8, 32], strides = [1, 1]} : vector<8x128xf32> to vector<8x32xf32>
    %307 = vector.extract_strided_slice %303 {offsets = [0, 96], sizes = [8, 32], strides = [1, 1]} : vector<8x128xf32> to vector<8x32xf32>
    %308 = arith.mulf %305, %264 : vector<8x32xf32>
    %309 = arith.mulf %304, %306 : vector<8x32xf32>
    %310 = arith.addf %308, %309 : vector<8x32xf32>
    %311 = math.tanh %310 : vector<8x32xf32>
    %312 = arith.mulf %307, %311 : vector<8x32xf32>
    %313 = arith.truncf %312 : vector<8x32xf32> to vector<8x32xbf16>
    %c0_112 = arith.constant 0 : index
    %c64_113 = arith.constant 64 : index
    %314 = vector.load %arg12[%c0_112, %c64_113] : memref<8x96xbf16, #tpu.memory_space<vmem>>, vector<8x32xbf16>
    tpu.vector_store %arg12[%c0_112, %c64_113], %313 {strides = array<i32>} : memref<8x96xbf16, #tpu.memory_space<vmem>>, vector<8x32xbf16>,
    %c40_114 = arith.constant 40 : index
    %c0_115 = arith.constant 0 : index
    %315 = vector.load %arg11[%c40_114, %c0_115] : memref<64x32xf32, #tpu.memory_space<vmem>>, vector<8x32xf32>
    tpu.vector_store %arg11[%c40_114, %c0_115], %312 {strides = array<i32>} : memref<64x32xf32, #tpu.memory_space<vmem>>, vector<8x32xf32>,
    %c48 = arith.constant 48 : index
    %c0_116 = arith.constant 0 : index
    %316 = vector.load %arg10[%c48, %c0_116] : memref<64x256xf32, #tpu.memory_space<vmem>>, vector<8x256xf32>
    %c0_117 = arith.constant 0 : index
    %c0_118 = arith.constant 0 : index
    %317 = vector.load %arg12[%c0_117, %c0_118] : memref<8x96xbf16, #tpu.memory_space<vmem>>, vector<8x64xbf16>
    %cst_119 = arith.constant dense<0.000000e+00> : vector<8x256xf32>
    %318 = tpu.matmul %317, %7, %cst_119 {dimension_numbers = #tpu.dot_dimension_numbers<[1], [0], [0], [1], [0, 0, 1, 1], [], []>} : vector<8x64xbf16>, vector<64x256xbf16>, vector<8x256xf32> -> vector<8x256xf32>
    %319 = arith.addf %316, %318 : vector<8x256xf32>
    %320 = arith.mulf %319, %20 : vector<8x256xf32>
    %321 = arith.negf %320 : vector<8x256xf32>
    %322 = math.exp %321 : vector<8x256xf32>
    %cst_120 = arith.constant 1.000000e+00 : f32
    %323 = vector.broadcast %cst_120 : f32 to vector<8x256xf32>
    %324 = arith.addf %323, %322 : vector<8x256xf32>
    %325 = arith.divf %323, %324 : vector<8x256xf32>
    %326 = arith.mulf %325, %20 : vector<8x256xf32>
    %327 = arith.addf %326, %23 : vector<8x256xf32>
    %328 = vector.extract_strided_slice %327 {offsets = [0, 0], sizes = [8, 64], strides = [1, 1]} : vector<8x256xf32> to vector<8x64xf32>
    %329 = vector.extract_strided_slice %327 {offsets = [0, 64], sizes = [8, 64], strides = [1, 1]} : vector<8x256xf32> to vector<8x64xf32>
    %330 = vector.extract_strided_slice %327 {offsets = [0, 128], sizes = [8, 64], strides = [1, 1]} : vector<8x256xf32> to vector<8x64xf32>
    %331 = vector.extract_strided_slice %327 {offsets = [0, 192], sizes = [8, 64], strides = [1, 1]} : vector<8x256xf32> to vector<8x64xf32>
    %332 = arith.mulf %329, %288 : vector<8x64xf32>
    %333 = arith.mulf %328, %330 : vector<8x64xf32>
    %334 = arith.addf %332, %333 : vector<8x64xf32>
    %335 = math.tanh %334 : vector<8x64xf32>
    %336 = arith.mulf %331, %335 : vector<8x64xf32>
    %337 = arith.truncf %336 : vector<8x64xf32> to vector<8x64xbf16>
    %c0_121 = arith.constant 0 : index
    %c0_122 = arith.constant 0 : index
    %338 = vector.load %arg12[%c0_121, %c0_122] : memref<8x96xbf16, #tpu.memory_space<vmem>>, vector<8x64xbf16>
    tpu.vector_store %arg12[%c0_121, %c0_122], %337 {strides = array<i32>} : memref<8x96xbf16, #tpu.memory_space<vmem>>, vector<8x64xbf16>,
    %c0_123 = arith.constant 0 : index
    %c0_124 = arith.constant 0 : index
    %339 = vector.load %arg12[%c0_123, %c0_124] : memref<8x96xbf16, #tpu.memory_space<vmem>>, vector<8x96xbf16>
    %cst_125 = arith.constant dense<0.000000e+00> : vector<8x128xf32>
    %340 = tpu.matmul %339, %8, %cst_125 {dimension_numbers = #tpu.dot_dimension_numbers<[1], [0], [0], [1], [0, 0, 1, 1], [], []>} : vector<8x96xbf16>, vector<96x128xbf16>, vector<8x128xf32> -> vector<8x128xf32>
    %341 = arith.addf %340, %11 : vector<8x128xf32>
    %342 = arith.mulf %341, %32 : vector<8x128xf32>
    %343 = arith.negf %342 : vector<8x128xf32>
    %344 = math.exp %343 : vector<8x128xf32>
    %cst_126 = arith.constant 1.000000e+00 : f32
    %345 = vector.broadcast %cst_126 : f32 to vector<8x128xf32>
    %346 = arith.addf %345, %344 : vector<8x128xf32>
    %347 = arith.divf %345, %346 : vector<8x128xf32>
    %348 = arith.mulf %347, %32 : vector<8x128xf32>
    %349 = arith.addf %348, %35 : vector<8x128xf32>
    %350 = vector.extract_strided_slice %349 {offsets = [0, 0], sizes = [8, 32], strides = [1, 1]} : vector<8x128xf32> to vector<8x32xf32>
    %351 = vector.extract_strided_slice %349 {offsets = [0, 32], sizes = [8, 32], strides = [1, 1]} : vector<8x128xf32> to vector<8x32xf32>
    %352 = vector.extract_strided_slice %349 {offsets = [0, 64], sizes = [8, 32], strides = [1, 1]} : vector<8x128xf32> to vector<8x32xf32>
    %353 = vector.extract_strided_slice %349 {offsets = [0, 96], sizes = [8, 32], strides = [1, 1]} : vector<8x128xf32> to vector<8x32xf32>
    %354 = arith.mulf %351, %310 : vector<8x32xf32>
    %355 = arith.mulf %350, %352 : vector<8x32xf32>
    %356 = arith.addf %354, %355 : vector<8x32xf32>
    %357 = math.tanh %356 : vector<8x32xf32>
    %358 = arith.mulf %353, %357 : vector<8x32xf32>
    %359 = arith.truncf %358 : vector<8x32xf32> to vector<8x32xbf16>
    %c0_127 = arith.constant 0 : index
    %c64_128 = arith.constant 64 : index
    %360 = vector.load %arg12[%c0_127, %c64_128] : memref<8x96xbf16, #tpu.memory_space<vmem>>, vector<8x32xbf16>
    tpu.vector_store %arg12[%c0_127, %c64_128], %359 {strides = array<i32>} : memref<8x96xbf16, #tpu.memory_space<vmem>>, vector<8x32xbf16>,
    %c48_129 = arith.constant 48 : index
    %c0_130 = arith.constant 0 : index
    %361 = vector.load %arg11[%c48_129, %c0_130] : memref<64x32xf32, #tpu.memory_space<vmem>>, vector<8x32xf32>
    tpu.vector_store %arg11[%c48_129, %c0_130], %358 {strides = array<i32>} : memref<64x32xf32, #tpu.memory_space<vmem>>, vector<8x32xf32>,
    %c56 = arith.constant 56 : index
    %c0_131 = arith.constant 0 : index
    %362 = vector.load %arg10[%c56, %c0_131] : memref<64x256xf32, #tpu.memory_space<vmem>>, vector<8x256xf32>
    %c0_132 = arith.constant 0 : index
    %c0_133 = arith.constant 0 : index
    %363 = vector.load %arg12[%c0_132, %c0_133] : memref<8x96xbf16, #tpu.memory_space<vmem>>, vector<8x64xbf16>
    %cst_134 = arith.constant dense<0.000000e+00> : vector<8x256xf32>
    %364 = tpu.matmul %363, %7, %cst_134 {dimension_numbers = #tpu.dot_dimension_numbers<[1], [0], [0], [1], [0, 0, 1, 1], [], []>} : vector<8x64xbf16>, vector<64x256xbf16>, vector<8x256xf32> -> vector<8x256xf32>
    %365 = arith.addf %362, %364 : vector<8x256xf32>
    %366 = arith.mulf %365, %20 : vector<8x256xf32>
    %367 = arith.negf %366 : vector<8x256xf32>
    %368 = math.exp %367 : vector<8x256xf32>
    %cst_135 = arith.constant 1.000000e+00 : f32
    %369 = vector.broadcast %cst_135 : f32 to vector<8x256xf32>
    %370 = arith.addf %369, %368 : vector<8x256xf32>
    %371 = arith.divf %369, %370 : vector<8x256xf32>
    %372 = arith.mulf %371, %20 : vector<8x256xf32>
    %373 = arith.addf %372, %23 : vector<8x256xf32>
    %374 = vector.extract_strided_slice %373 {offsets = [0, 0], sizes = [8, 64], strides = [1, 1]} : vector<8x256xf32> to vector<8x64xf32>
    %375 = vector.extract_strided_slice %373 {offsets = [0, 64], sizes = [8, 64], strides = [1, 1]} : vector<8x256xf32> to vector<8x64xf32>
    %376 = vector.extract_strided_slice %373 {offsets = [0, 128], sizes = [8, 64], strides = [1, 1]} : vector<8x256xf32> to vector<8x64xf32>
    %377 = vector.extract_strided_slice %373 {offsets = [0, 192], sizes = [8, 64], strides = [1, 1]} : vector<8x256xf32> to vector<8x64xf32>
    %378 = arith.mulf %375, %334 : vector<8x64xf32>
    %379 = arith.mulf %374, %376 : vector<8x64xf32>
    %380 = arith.addf %378, %379 : vector<8x64xf32>
    %381 = math.tanh %380 : vector<8x64xf32>
    %382 = arith.mulf %377, %381 : vector<8x64xf32>
    %383 = arith.truncf %382 : vector<8x64xf32> to vector<8x64xbf16>
    %c0_136 = arith.constant 0 : index
    %c0_137 = arith.constant 0 : index
    %384 = vector.load %arg12[%c0_136, %c0_137] : memref<8x96xbf16, #tpu.memory_space<vmem>>, vector<8x64xbf16>
    tpu.vector_store %arg12[%c0_136, %c0_137], %383 {strides = array<i32>} : memref<8x96xbf16, #tpu.memory_space<vmem>>, vector<8x64xbf16>,
    %c0_138 = arith.constant 0 : index
    %c0_139 = arith.constant 0 : index
    %385 = vector.load %arg12[%c0_138, %c0_139] : memref<8x96xbf16, #tpu.memory_space<vmem>>, vector<8x96xbf16>
    %cst_140 = arith.constant dense<0.000000e+00> : vector<8x128xf32>
    %386 = tpu.matmul %385, %8, %cst_140 {dimension_numbers = #tpu.dot_dimension_numbers<[1], [0], [0], [1], [0, 0, 1, 1], [], []>} : vector<8x96xbf16>, vector<96x128xbf16>, vector<8x128xf32> -> vector<8x128xf32>
    %387 = arith.addf %386, %11 : vector<8x128xf32>
    %388 = arith.mulf %387, %32 : vector<8x128xf32>
    %389 = arith.negf %388 : vector<8x128xf32>
    %390 = math.exp %389 : vector<8x128xf32>
    %cst_141 = arith.constant 1.000000e+00 : f32
    %391 = vector.broadcast %cst_141 : f32 to vector<8x128xf32>
    %392 = arith.addf %391, %390 : vector<8x128xf32>
    %393 = arith.divf %391, %392 : vector<8x128xf32>
    %394 = arith.mulf %393, %32 : vector<8x128xf32>
    %395 = arith.addf %394, %35 : vector<8x128xf32>
    %396 = vector.extract_strided_slice %395 {offsets = [0, 0], sizes = [8, 32], strides = [1, 1]} : vector<8x128xf32> to vector<8x32xf32>
    %397 = vector.extract_strided_slice %395 {offsets = [0, 32], sizes = [8, 32], strides = [1, 1]} : vector<8x128xf32> to vector<8x32xf32>
    %398 = vector.extract_strided_slice %395 {offsets = [0, 64], sizes = [8, 32], strides = [1, 1]} : vector<8x128xf32> to vector<8x32xf32>
    %399 = vector.extract_strided_slice %395 {offsets = [0, 96], sizes = [8, 32], strides = [1, 1]} : vector<8x128xf32> to vector<8x32xf32>
    %400 = arith.mulf %397, %356 : vector<8x32xf32>
    %401 = arith.mulf %396, %398 : vector<8x32xf32>
    %402 = arith.addf %400, %401 : vector<8x32xf32>
    %403 = math.tanh %402 : vector<8x32xf32>
    %404 = arith.mulf %399, %403 : vector<8x32xf32>
    %405 = arith.truncf %404 : vector<8x32xf32> to vector<8x32xbf16>
    %c0_142 = arith.constant 0 : index
    %c64_143 = arith.constant 64 : index
    %406 = vector.load %arg12[%c0_142, %c64_143] : memref<8x96xbf16, #tpu.memory_space<vmem>>, vector<8x32xbf16>
    tpu.vector_store %arg12[%c0_142, %c64_143], %405 {strides = array<i32>} : memref<8x96xbf16, #tpu.memory_space<vmem>>, vector<8x32xbf16>,
    %c56_144 = arith.constant 56 : index
    %c0_145 = arith.constant 0 : index
    %407 = vector.load %arg11[%c56_144, %c0_145] : memref<64x32xf32, #tpu.memory_space<vmem>>, vector<8x32xf32>
    tpu.vector_store %arg11[%c56_144, %c0_145], %404 {strides = array<i32>} : memref<64x32xf32, #tpu.memory_space<vmem>>, vector<8x32xf32>,
    %c0_146 = arith.constant 0 : index
    %c0_147 = arith.constant 0 : index
    %408 = vector.load %arg11[%c0_146, %c0_147] : memref<64x32xf32, #tpu.memory_space<vmem>>, vector<64x32xf32>
    %409 = arith.truncf %408 : vector<64x32xf32> to vector<64x32xbf16>
    %c0_148 = arith.constant 0 : index
    %c0_149 = arith.constant 0 : index
    %410 = vector.load %arg7[%c0_148, %c0_149] : memref<32x128xbf16, #tpu.memory_space<vmem>>, vector<32x128xbf16>
    %cst_150 = arith.constant dense<0.000000e+00> : vector<64x128xf32>
    %411 = tpu.matmul %409, %410, %cst_150 {dimension_numbers = #tpu.dot_dimension_numbers<[1], [0], [0], [1], [0, 0, 1, 1], [], []>} : vector<64x32xbf16>, vector<32x128xbf16>, vector<64x128xf32> -> vector<64x128xf32>
    %c0_151 = arith.constant 0 : index
    %c0_152 = arith.constant 0 : index
    %412 = vector.load %arg8[%c0_151, %c0_152] : memref<1x128xf32, #tpu.memory_space<vmem>>, vector<1x128xf32>
    %413 = vector.broadcast %412 : vector<1x128xf32> to vector<64x128xf32>
    %414 = arith.addf %411, %413 : vector<64x128xf32>
    %415 = arith.negf %414 : vector<64x128xf32>
    %416 = math.exp %415 : vector<64x128xf32>
    %cst_153 = arith.constant 1.000000e+00 : f32
    %417 = vector.broadcast %cst_153 : f32 to vector<64x128xf32>
    %418 = arith.addf %417, %416 : vector<64x128xf32>
    %419 = arith.divf %417, %418 : vector<64x128xf32>
    %c0_154 = arith.constant 0 : index
    %c0_155 = arith.constant 0 : index
    %420 = vector.load %arg9[%c0_154, %c0_155] : memref<64x128xf32, #tpu.memory_space<vmem>>, vector<64x128xf32>
    tpu.vector_store %arg9[%c0_154, %c0_155], %419 {strides = array<i32>} : memref<64x128xf32, #tpu.memory_space<vmem>>, vector<64x128xf32>,
    return
  }
  func.func @transform_0(%arg0: i32) -> (i32, i32) {
    %c0_i32 = arith.constant 0 : i32
    %c0_i32_0 = arith.constant 0 : i32
    %c0_i32_1 = arith.constant 0 : i32
    return %c0_i32, %c0_i32_0 : i32, i32
  }
  func.func @transform_1(%arg0: i32) -> (i32, i32) {
    %c0_i32 = arith.constant 0 : i32
    %c0_i32_0 = arith.constant 0 : i32
    %c0_i32_1 = arith.constant 0 : i32
    return %c0_i32, %c0_i32_0 : i32, i32
  }
  func.func @transform_2(%arg0: i32) -> (i32, i32) {
    %c0_i32 = arith.constant 0 : i32
    %c0_i32_0 = arith.constant 0 : i32
    %c0_i32_1 = arith.constant 0 : i32
    return %c0_i32, %c0_i32_0 : i32, i32
  }
  func.func @transform_3(%arg0: i32) -> (i32, i32) {
    %c0_i32 = arith.constant 0 : i32
    %c0_i32_0 = arith.constant 0 : i32
    %c0_i32_1 = arith.constant 0 : i32
    return %c0_i32, %c0_i32_0 : i32, i32
  }
  func.func @transform_4(%arg0: i32) -> (i32, i32) {
    %c0_i32 = arith.constant 0 : i32
    %c0_i32_0 = arith.constant 0 : i32
    %c0_i32_1 = arith.constant 0 : i32
    return %c0_i32, %c0_i32_0 : i32, i32
  }
  func.func @transform_5(%arg0: i32) -> (i32, i32) {
    %c0_i32 = arith.constant 0 : i32
    %c0_i32_0 = arith.constant 0 : i32
    %c0_i32_1 = arith.constant 0 : i32
    return %c0_i32, %c0_i32_0 : i32, i32
  }
  func.func @transform_6(%arg0: i32) -> (i32, i32) {
    %c0_i32 = arith.constant 0 : i32
    %c0_i32_0 = arith.constant 0 : i32
    %c0_i32_1 = arith.constant 0 : i32
    return %c0_i32, %c0_i32_0 : i32, i32
  }
  func.func @transform_7(%arg0: i32) -> (i32, i32) {
    %c0_i32 = arith.constant 0 : i32
    %c0_i32_0 = arith.constant 0 : i32
    %c0_i32_1 = arith.constant 0 : i32
    return %c0_i32, %c0_i32_0 : i32, i32
  }
  func.func @transform_8(%arg0: i32) -> (i32, i32) {
    %c0_i32 = arith.constant 0 : i32
    %c0_i32_0 = arith.constant 0 : i32
    %c0_i32_1 = arith.constant 0 : i32
    return %c0_i32, %c0_i32_0 : i32, i32
  }
}

</mosaic_0001>

<bundles_post_ra>
// kernel: lstm_predictor_forward.1
= control target key start
LH: loop header
LB: loop body
LE: loop exit
PB: predicated region body
PF: predicated region fallthrough
CT: control target
= control target key end

     0   :  { %13 = vsyncpa [#allocation6], 0  ;;  %s3195_s0 = inlined_call_operand.vmem [shape: bf16[64,32], index: 0, kind: input, shape index: {}]   ;;  %s3196_s1 = inlined_call_operand.vmem [shape: bf16[32,256], index: 1, kind: input, shape index: {}]   ;;  %s3197_s2 = inlined_call_operand.vmem [shape: bf16[64,256], index: 2, kind: input, shape index: {}]   ;;  %s3198_s3 = inlined_call_operand.vmem [shape: f32[1,256], index: 3, kind: input, shape index: {}]   ;;  %s3199_s4 = inlined_call_operand.hbm [shape: bf16[96,128], index: 4, kind: input, shape index: {}]   ;;  %s3200_s5 = inlined_call_operand.vmem [shape: f32[1,128], index: 5, kind: input, shape index: {}]   ;;  %s3201_s6 = inlined_call_operand.hbm [shape: bf16[32,128], index: 6, kind: input, shape index: {}]   ;;  %s3202_s7 = inlined_call_operand.vmem [shape: f32[1,128], index: 7, kind: input, shape index: {}]   ;;  %s3203_s8 = inlined_call_operand.vmem [shape: f32[64,128], index: 8, kind: output, shape index: {}]  }
   0x1   :  { %14 = vsyncpa [#allocation8], 0  ;;  %s2436_s27 = smov [#allocation5]  }
   0x2   :  { %s28_s28 = sshll.u32 %s2436_s27, 4  ;;  %s29_s28 = int_to_ptr.vmem [resolvable:$true] %s28_s28 }
   0x3   :  { %s2400_s29 = scalar_lea.vmem %s29_s28, 768  ;;  %p2405_p1 = scmp.lt.s32.totalorder %s29_s28, %s29_s28 }
   0x4   :  { %p2401_p0 = scmp.ne.s32.totalorder %s29_s28, %s2400_s29  ;;  %p2406_p2 = scmp.lt.s32.totalorder %s2400_s29, %s2400_s29 }
   0x6   :  { %p2407_p3 = por %p2406_p2, %p2405_p1 }
   0x8   :  { %p2408_p4 = pnand %p2407_p3, %p2401_p0 }
   0xa   :  { %2411 = shalt.err (!%p2408_p4)
}
   0xb   :  { %s2437_s30 = smov 64   ;;  %s2438_s9 = smov 4  }
   0xc   :  { %34 = dma.hbm_to_vmem [thread:$0]  %s3199_s4, 768, %s29_s28, [#allocation6], %s2437_s30, %s2437_s30, %s2438_s9  }
   0xd   :  { %s2439_s12 = smov [#allocation7]  }
   0xe   :  { %s42_s13 = sshll.u32 %s2439_s12, 4  ;;  %s43_s13 = int_to_ptr.vmem [resolvable:$true] %s42_s13 }
   0xf   :  { %s2420_s14 = scalar_lea.vmem %s43_s13, 256  ;;  %p2425_p6 = scmp.lt.s32.totalorder %s43_s13, %s43_s13 }
  0x10   :  { %p2421_p5 = scmp.ne.s32.totalorder %s43_s13, %s2420_s14  ;;  %p2426_p7 = scmp.lt.s32.totalorder %s2420_s14, %s2420_s14 }
  0x12   :  { %p2427_p8 = por %p2426_p7, %p2425_p6 }
  0x14   :  { %p2428_p9 = pnand %p2427_p8, %p2421_p5 }
  0x16   :  { %2431 = shalt.err (!%p2428_p9)
}
  0x17   :  { %48 = dma.hbm_to_vmem [thread:$0]  %s3201_s6, 256, %s43_s13, [#allocation8], %s2437_s30, %s2437_s30, %s2438_s9  }
  0x18   :  { %2432 = dma.done.wait [#allocation6], 768  }
  0x19   :  { %2433 = vsyncadd [#allocation6], 4294966528 }
  0x1a   :  { %2434 = dma.done.wait [#allocation8], 256  }
  0x1b   :  { %2435 = vsyncadd [#allocation8], 4294967040  ;;  %vm269_vm0 = vcmask 781312   ;;  %v2440_v0 = vmov 0   ;;  %v2187_v1 = vld [vmem:[%s3196_s1 + $0x14] ss:$8 sps:$4 sm:$0xff]   ;;  %v72_v16 = vlaneseq }
  0x1c   :  { %167 = vmatprep.mubr.bf16.mxu0 %v2440_v0  ;;  %270 = vst.msk [vmem:[#allocation4] sm:$0xf] %vm269_vm0, %v2440_v0  ;;  %350 = vmatprep.mubr.bf16.mxu1 %v2440_v0  ;;  %v2510_v2 = vld [vmem:[%s3197_s2 + $0x34] ss:$8 sps:$4 sm:$0xff]   ;;  %v2191_v3 = vld [vmem:[%s3196_s1 + $0x10] ss:$8 sps:$4 sm:$0xff]  }
  0x1d   :  { %147 = vmatprep.subr.bf16.mxu0 %v2187_v1  ;;  %v2518_v4 = vld [vmem:[%s3197_s2 + $0x30] ss:$8 sps:$4 sm:$0xff]   ;;  %326 = vmatprep.subr.bf16.mxu1 %v2510_v2  ;;  %v2193_v5 = vld [vmem:[%s3196_s1 + $0x4] ss:$8 sps:$4 sm:$0xff]   ;;  %v2197_v7 = vld [vmem:[%s3196_s1] ss:$8 sps:$4 sm:$0xff]  }
  0x1e   :  { %148 = vmatpush1.bf16.msra.mxu0 %v2191_v3  ;;  %327 = vmatpush1.bf16.msra.mxu1 %v2518_v4  ;;  %v2528_v6 = vld [vmem:[%s3197_s2 + $0x24] ss:$8 sps:$4 sm:$0xff]   ;;  %v2536_v8 = vld [vmem:[%s3197_s2 + $0x20] ss:$8 sps:$4 sm:$0xff]   ;;  %v2545_v10 = vld [vmem:[%s3197_s2 + $0x14] ss:$8 sps:$4 sm:$0xff]  }
  0x1f   :  { %149 = vmatprep.subr.bf16.mxu0 %v2193_v5  ;;  %328 = vmatprep.subr.bf16.mxu1 %v2528_v6  ;;  %v2199_v9 = vld [vmem:[%s3195_s0] sm:$0xff]   ;;  %vm122_vm1 = vcmask 261120   ;;  %v2551_v11 = vld [vmem:[%s3197_s2 + $0x10] ss:$8 sps:$4 sm:$0xff]   ;;  %vm314_vm2 = vcmask 523264   ;;  %v2441_v15 = vmov 0.0  }
  0x20   :  { %v2557_v12 = vld [vmem:[%s3197_s2 + $0x4] ss:$8 sps:$4 sm:$0xff]   ;;  %v2562_v13 = vld [vmem:[%s3197_s2] ss:$8 sps:$4 sm:$0xff]   ;;  %v73_v17 = vshrl.u32 %v72_v16, 7  ;;  %v2584_v20 = vand.u32 127, %v72_v16 }
  0x21   :  { %v70_v19 = vld [vmem:[%s3198_s3] sm:$0x3]  ;;  %v2442_v31 = vmov 1.0   ;;  %v2605_v50 = vld [vmem:[#allocation5 + $0x28] sm:$0xff]   ;;  %v2611_v52 = vld [vmem:[#allocation5 + $0x20] sm:$0xff]   ;;  %vm2443_vm4 = vmmov 0  }
  0x22   :  { %150 = vmatpush1.bf16.msra.mxu0 %v2197_v7  ;;  %329 = vmatpush1.bf16.msra.mxu1 %v2536_v8  ;;  %v74_v18 = vsub.s32 0, %v73_v17  ;;  %v78_v22 = vsub.s32 1, %v73_v17  ;;  %v253_v23 = vadd.s32 128, %v2584_v20  ;;  %v2207_v51 = vld [vmem:[%s3195_s0 + $0x8] sm:$0xff]   ;;  %v2617_v53 = vld [vmem:[#allocation5 + $0x18] sm:$0xff]   ;;  %v2209_v54 = vld [vmem:[%s3195_s0 + $0x10] sm:$0xff]  }
  0x23   :  { %330 = vmatprep.subr.bf16.mxu1 %v2545_v10  ;;  %v273_v14 = vld [vmem:[#allocation4] sm:$0xf]  ;;  %2037 = vmatprep.subr.bf16.mxu0 %v2441_v15  ;;  %v2624_v55 = vld [vmem:[#allocation5 + $0x10] sm:$0xff]   ;;  %v2630_v56 = vld [vmem:[#allocation5 + $0x8] sm:$0xff]   ;;  %vm395_vm5 = vcmask 519168   ;;  %vm434_vm6 = vcmask 785408  }
  0x24   :  { %v2586_v21 = vrot.slane %v70_v19, %v74_v18  ;;  %v2590_v26 = vrot.slane %v70_v19, %v78_v22  ;;  %vm257_vm3 = vcmp.lt.s32.totalorder %v253_v23, 192  ;;  %v2212_v57 = vld [vmem:[%s3195_s0 + $0x18] sm:$0xff]   ;;  %v2642_v61 = vld [vmem:[#allocation5] sm:$0xff]   ;;  %vm264_vm7 = vcmp.ge.s32.totalorder %v2584_v20, 64  ;;  %s2444_s25 = smov 32   ;;  %s2445_s26 = smov 96  }
  0x25   :  { %1869 = vmatmul.mubr.msk.bf16.vlgmr.msra.gmra.mxu0 %vm122_vm1, %v2199_v9  ;;  %v2595_v32 = vsel %vm257_vm3, 2.0, %v2442_v31  ;;  %v2600_v45 = vsel %vm257_vm3, -1.0, %v2441_v15  ;;  %vm265_vm8 = vcmp.lt.s32.totalorder %v2584_v20, 96  ;;  %vm511_vm10 = vcmask 781824  }
  0x26   :  { %331 = vmatpush1.bf16.msra.mxu1 %v2551_v11  ;;  %177 = vmatprep.mubr.bf16.mxu0 %v2440_v0  ;;  %vm2688_vm9 = vmand %vm264_vm7, %vm265_vm8 }
  0x27   :  { %332 = vmatprep.subr.bf16.mxu1 %v2557_v12  ;;  %2038 = vmatpush3.bf16.msra.mxu0 %v2605_v50 }
  0x28   :  { %2039 = vmatprep.subr.bf16.mxu0 %v2441_v15 }
  0x2a   :  { %333 = vmatpush1.bf16.msra.mxu1 %v2562_v13 }
  0x2b   :  { %532 = vmatprep.subr.bf16.mxu1 %v2510_v2  ;;  %2040 = vmatpush3.bf16.msra.mxu0 %v2611_v52 }
  0x2c   :  { %2041 = vmatprep.subr.bf16.mxu0 %v2441_v15 }
  0x2d   :  { %1882 = vmatmul.mubr.msk.bf16.vlgmr.msra.gmra.mxu1 %vm314_vm2, %v273_v14  ;;  %1870 = vmatmul.mubr.msk.bf16.gmra.mxu0 %vm122_vm1, %v2207_v51 }
  0x2e   :  { %533 = vmatpush1.bf16.msra.mxu1 %v2518_v4  ;;  %556 = vmatprep.mubr.bf16.mxu1 %v2440_v0 }
  0x2f   :  { %534 = vmatprep.subr.bf16.mxu1 %v2528_v6  ;;  %187 = vmatprep.mubr.bf16.mxu0 %v2440_v0 }
  0x30   :  { %2042 = vmatpush3.bf16.msra.mxu0 %v2617_v53 }
  0x31   :  { %2043 = vmatprep.subr.bf16.mxu0 %v2441_v15 }
  0x32   :  { %535 = vmatpush1.bf16.msra.mxu1 %v2536_v8 }
  0x33   :  { %536 = vmatprep.subr.bf16.mxu1 %v2545_v10 }
  0x34   :  { %2044 = vmatpush3.bf16.msra.mxu0 %v2624_v55 }
  0x35   :  { %1871 = vmatmul.mubr.msk.bf16.gmra.mxu0 %vm122_vm1, %v2209_v54  ;;  %2045 = vmatprep.subr.bf16.mxu0 %v2441_v15 }
  0x36   :  { %537 = vmatpush1.bf16.msra.mxu1 %v2551_v11  ;;  %197 = vmatprep.mubr.bf16.mxu0 %v2440_v0 }
  0x37   :  { %538 = vmatprep.subr.bf16.mxu1 %v2557_v12 }
  0x38   :  { %2046 = vmatpush3.bf16.msra.mxu0 %v2630_v56 }
  0x39   :  { %2047 = vmatprep.subr.bf16.mxu0 %v2441_v15 }
  0x3a   :  { %539 = vmatpush1.bf16.msra.mxu1 %v2562_v13 }
  0x3b   :  { %2053 = vmatprep.subr.bf16.mxu1 %v2441_v15 }
  0x3c   :  { %2048 = vmatpush3.bf16.msra.mxu0 %v2642_v61 }
  0x3d   :  { %1872 = vmatmul.mubr.msk.bf16.gmra.mxu0 %vm122_vm1, %v2212_v57  ;;  %699 = vmatprep.subr.bf16.mxu0 %v2510_v2 }
  0x3e   :  { %2049 = vmatprep.mubr.msk.bf16.mxu0 %vm2443_vm4, %v2441_v15 }
  0xe5   :  { %v169_v24 = vpop.f32.mrf.mxu0 }
  0xe6   :  { %v170_v25 = vadd.f32 %v169_v24, %v2586_v21 }
  0xe7   :  { %v171_v27 = vpop.f32.mrf.mxu0 }
  0xe8   :  { %v172_v29 = vadd.f32 %v171_v27, %v2590_v26 }
  0xe9   :  { %v2660_v7 = vpop.f32.mrf.mxu0 }
  0xeb   :  { %v2662_v9 = vpop.f32.mrf.mxu0 }
  0xed   :  { %v352_v28 = vpop.f32.mrf.mxu1  ;;  %v2664_v14 = vpop.f32.mrf.mxu0 }
  0xee   :  { %v359_v30 = vadd.f32 %v352_v28, %v170_v25 }
  0xef   :  { %v354_v33 = vpop.f32.mrf.mxu1  ;;  %v2666_v16 = vpop.f32.mrf.mxu0 }
  0xf0   :  { %v360_v34 = vadd.f32 %v354_v33, %v172_v29  ;;  %v1883_v35 = vmul.f32 -1.442695, %v359_v30  ;;  %v2697_v33 = vld [vmem:[%s3200_s5] ss:$0 sm:$0xff]  ;;  %v176_v29 = vadd.f32 %v2662_v9, %v2590_v26 }
  0xf1   :  { %v356_v36 = vpop.f32.mrf.mxu1  ;;  %v2668_v17 = vpop.f32.mrf.mxu0 }
  0xf2   :  { %v362_v37 = vmul.f32 %v360_v34, %v2595_v32  ;;  %2217 = vpow2.f32 %v1883_v35  ;;  %v2702_v34 = vsel %vm2688_vm9, 2.0, %v2442_v31 }
  0xf3   :  { %v357_v38 = vpop.f32.mrf.mxu1  ;;  %v2670_v18 = vpop.f32.mrf.mxu0 }
  0xf4   :  { %v1884_v39 = vmul.f32 -1.442695, %v362_v37 }
  0xf5   :  { %v2672_v19 = vpop.f32.mrf.mxu0 }
  0xf6   :  { %2219 = vpow2.f32 %v1884_v39 }
  0xf7   :  { %v2674_v22 = vpop.f32.mrf.mxu0 }
  0xf9   :  { %v2676_v23 = vpop.f32.mrf.mxu0 }
  0xfb   :  { %v2678_v24 = vpop.f32.mrf.mxu0 }
  0xfd   :  { %v2680_v25 = vpop.f32.mrf.mxu0 }
  0xff   :  { %v2218_v40 = vpop.eup %2217  ;;  %v2682_v27 = vpop.f32.mrf.mxu0 }
 0x100   :  { %v369_v43 = vadd.f32 1.0, %v2218_v40 }
 0x101   :  { %v2684_v28 = vpop.f32.mrf.mxu0 }
 0x103   :  { %v2220_v41 = vpop.eup %2219  ;;  %v2692_v30 = vpop.f32.mrf.mxu0 }
 0x104   :  { %v370_v42 = vadd.f32 1.0, %v2220_v41 }
 0x106   :  { %2221 = vrcp.f32 %v370_v42 }
 0x107   :  { %2223 = vrcp.f32 %v369_v43 }
 0x113   :  { %v2222_v44 = vpop.eup %2221 }
 0x114   :  { %v376_v46 = vmul.f32 %v2222_v44, %v2595_v32  ;;  %v2224_v48 = vpop.eup %2223  ;;  %v2709_v44 = vsel %vm2688_vm9, -1.0, %v2441_v15 }
 0x115   :  { %v379_v58 = vmul.f32 0.0, %v2224_v48 }
 0x116   :  { %v378_v47 = vadd.f32 %v376_v46, %v2600_v45 }
 0x118   :  { %v380_v49 = vmul.f32 %v2224_v48, %v378_v47 }
 0x11a   :  { %382 = vrot.lane.b32.xlu0 %v380_v49, %s2437_s30 }
 0x18c   :  { %v383_v59 = vpop.permute.xlu0 %382 }
 0x18d   :  { %v2639_v60 = vadd.f32 %v383_v59, %v379_v58 }
 0x18f   :  { %2225 = vtanh.f32 %v2639_v60 }
 0x19c   :  { %v2226_v62 = vpop.eup %2225 }
 0x19d   :  { %v387_v63 = vmul.f32 %v2226_v62, %v378_v47 }
 0x19f   :  { %v1959_v1 = vpack.c.bf16 %v387_v63, %v387_v63 }
 0x1a1   :  { %392 = vrot.lane.b32.xlu0 %v1959_v1, %s2437_s30 }
 0x213   :  { %v393_v3 = vpop.permute.xlu0 %392 }
 0x214   :  { %396 = vst.msk [vmem:[#allocation4] sm:$0xf] %vm395_vm5, %v393_v3  ;;  %v174_v3 = vadd.f32 %v2660_v7, %v2586_v21 }
 0x21b   :  { %v397_v5 = vld [vmem:[#allocation4] sm:$0xf] }
 0x21c   :  { %2050 = vmatmul.mubr.msk.bf16.vlgmr.msra.gmra.mxu0 %vm434_vm6, %v397_v5 }
 0x21d   :  { %700 = vmatpush1.bf16.msra.mxu0 %v2518_v4  ;;  %723 = vmatprep.mubr.bf16.mxu0 %v2440_v0 }
 0x21e   :  { %701 = vmatprep.subr.bf16.mxu0 %v2528_v6 }
 0x221   :  { %702 = vmatpush1.bf16.msra.mxu0 %v2536_v8 }
 0x222   :  { %703 = vmatprep.subr.bf16.mxu0 %v2545_v10 }
 0x225   :  { %704 = vmatpush1.bf16.msra.mxu0 %v2551_v11 }
 0x226   :  { %705 = vmatprep.subr.bf16.mxu0 %v2557_v12 }
 0x229   :  { %706 = vmatpush1.bf16.msra.mxu0 %v2562_v13 }
 0x22a   :  { %2069 = vmatprep.subr.bf16.mxu0 %v2441_v15 }
 0x2dc   :  { %v472_v35 = vpop.f32.mrf.mxu0 }
 0x2dd   :  { %v473_v36 = vadd.f32 %v2697_v33, %v472_v35 }
 0x2de   :  { %v2051_v20 = vpop.f32.mrf.mxu0 }
 0x2df   :  { %v478_v37 = vmul.f32 %v473_v36, %v2702_v34 }
 0x2e0   :  { %v475_v38 = vpop.f32.mrf.mxu0 }
 0x2e1   :  { %v1893_v39 = vmul.f32 -1.442695, %v478_v37 }
 0x2e2   :  { %v2052_v40 = vpop.f32.mrf.mxu0 }
 0x2e3   :  { %2227 = vpow2.f32 %v1893_v39 }
 0x2f0   :  { %v2228_v41 = vpop.eup %2227 }
 0x2f1   :  { %v482_v42 = vadd.f32 1.0, %v2228_v41 }
 0x2f3   :  { %2229 = vrcp.f32 %v482_v42 }
 0x300   :  { %v2230_v43 = vpop.eup %2229 }
 0x301   :  { %v485_v31 = vmul.f32 %v2230_v43, %v2702_v34 }
 0x303   :  { %v486_v46 = vadd.f32 %v485_v31, %v2709_v44 }
 0x305   :  { %489 = vrot.lane.b32.xlu1 %v486_v46, %s2437_s30  ;;  %v487_v49 = vmul.f32 0.0, %v486_v46 }
 0x377   :  { %v490_v47 = vpop.permute.xlu1 %489 }
 0x378   :  { %v492_v48 = vmul.f32 %v490_v47, %v486_v46 }
 0x37a   :  { %494 = vrot.lane.b32.xlu1 %v492_v48, %s2444_s25 }
 0x3ec   :  { %v495_v51 = vpop.permute.xlu1 %494 }
 0x3ed   :  { %v2715_v54 = vadd.f32 %v495_v51, %v487_v49 }
 0x3ef   :  { %2231 = vtanh.f32 %v2715_v54 }
 0x3fc   :  { %v2232_v57 = vpop.eup %2231 }
 0x3fd   :  { %500 = vrot.lane.b32.xlu0 %v2232_v57, %s2437_s30 }
 0x46f   :  { %v501_v58 = vpop.permute.xlu0 %500 }
 0x470   :  { %v2719_v59 = vmul.f32 %v501_v58, %v486_v46 }
 0x472   :  { %v1960_v62 = vpack.c.bf16 %v2719_v59, %v2719_v59 }
 0x474   :  { %508 = vrot.lane.b32.xlu1 %v1960_v62, %s2445_s26 }
 0x4e6   :  { %v509_v63 = vpop.permute.xlu1 %508 }
 0x4e7   :  { %512 = vst.msk [vmem:[#allocation4] sm:$0xf] %vm511_vm10, %v509_v63 }
 0x4ee   :  { %v520_v1 = vld [vmem:[#allocation4] sm:$0xf] }
 0x4ef   :  { %1895 = vmatmul.mubr.msk.bf16.vlgmr.msra.gmra.mxu1 %vm314_vm2, %v520_v1 }
 0x4f0   :  { %2054 = vmatpush3.bf16.msra.mxu1 %v2605_v50  ;;  %2065 = vmatprep.mubr.msk.bf16.mxu1 %vm2443_vm4, %v2441_v15 }
 0x4f1   :  { %2055 = vmatprep.subr.bf16.mxu1 %v2441_v15 }
 0x4f4   :  { %2056 = vmatpush3.bf16.msra.mxu1 %v2611_v52 }
 0x4f5   :  { %2057 = vmatprep.subr.bf16.mxu1 %v2441_v15 }
 0x4f8   :  { %2058 = vmatpush3.bf16.msra.mxu1 %v2617_v53 }
 0x4f9   :  { %2059 = vmatprep.subr.bf16.mxu1 %v2441_v15 }
 0x4fc   :  { %2060 = vmatpush3.bf16.msra.mxu1 %v2624_v55 }
 0x4fd   :  { %2061 = vmatprep.subr.bf16.mxu1 %v2441_v15 }
 0x500   :  { %2062 = vmatpush3.bf16.msra.mxu1 %v2630_v56 }
 0x501   :  { %2063 = vmatprep.subr.bf16.mxu1 %v2441_v15 }
 0x504   :  { %2064 = vmatpush3.bf16.msra.mxu1 %v2642_v61 }
 0x505   :  { %866 = vmatprep.subr.bf16.mxu1 %v2510_v2 }
 0x5af   :  { %v558_v5 = vpop.f32.mrf.mxu1 }
 0x5b0   :  { %v565_v35 = vadd.f32 %v558_v5, %v174_v3 }
 0x5b1   :  { %v560_v36 = vpop.f32.mrf.mxu1 }
 0x5b2   :  { %v566_v20 = vadd.f32 %v560_v36, %v176_v29  ;;  %v1896_v37 = vmul.f32 -1.442695, %v565_v35 }
 0x5b3   :  { %v562_v38 = vpop.f32.mrf.mxu1 }
 0x5b4   :  { %v568_v39 = vmul.f32 %v566_v20, %v2595_v32  ;;  %2233 = vpow2.f32 %v1896_v37 }
 0x5b5   :  { %v563_v40 = vpop.f32.mrf.mxu1 }
 0x5b6   :  { %v1897_v41 = vmul.f32 -1.442695, %v568_v39 }
 0x5b8   :  { %2235 = vpow2.f32 %v1897_v41 }
 0x5c1   :  { %v2234_v42 = vpop.eup %2233 }
 0x5c2   :  { %v575_v46 = vadd.f32 1.0, %v2234_v42 }
 0x5c5   :  { %v2236_v43 = vpop.eup %2235 }
 0x5c6   :  { %v576_v31 = vadd.f32 1.0, %v2236_v43 }
 0x5c8   :  { %2237 = vrcp.f32 %v576_v31 }
 0x5c9   :  { %2239 = vrcp.f32 %v575_v46 }
 0x5d5   :  { %v2238_v7 = vpop.eup %2237 }
 0x5d6   :  { %v582_v9 = vmul.f32 %v2238_v7, %v2595_v32  ;;  %v2240_v48 = vpop.eup %2239 }
 0x5d7   :  { %v585_v51 = vmul.f32 %v2240_v48, %v2639_v60 }
 0x5d8   :  { %v584_v47 = vadd.f32 %v582_v9, %v2600_v45 }
 0x5da   :  { %v586_v49 = vmul.f32 %v2240_v48, %v584_v47 }
 0x5dc   :  { %588 = vrot.lane.b32.xlu0 %v586_v49, %s2437_s30 }
 0x64e   :  { %v589_v57 = vpop.permute.xlu0 %588 }
 0x64f   :  { %v2749_v58 = vadd.f32 %v589_v57, %v585_v51 }
 0x651   :  { %2241 = vtanh.f32 %v2749_v58 }
 0x65e   :  { %v2242_v62 = vpop.eup %2241 }
 0x65f   :  { %v593_v63 = vmul.f32 %v2242_v62, %v584_v47 }
 0x661   :  { %v1961_v1 = vpack.c.bf16 %v593_v63, %v593_v63  ;;  %v180_v63 = vadd.f32 %v2664_v14, %v2586_v21 }
 0x663   :  { %598 = vrot.lane.b32.xlu1 %v1961_v1, %s2437_s30 }
 0x6d5   :  { %v599_v3 = vpop.permute.xlu1 %598 }
 0x6d6   :  { %601 = vst.msk [vmem:[#allocation4] sm:$0xf] %vm395_vm5, %v599_v3  ;;  %v182_v3 = vadd.f32 %v2666_v16, %v2590_v26 }
 0x6dd   :  { %v602_v5 = vld [vmem:[#allocation4] sm:$0xf] }
 0x6de   :  { %2066 = vmatmul.mubr.msk.bf16.vlgmr.msra.gmra.mxu1 %vm434_vm6, %v602_v5 }
 0x6df   :  { %867 = vmatpush1.bf16.msra.mxu1 %v2518_v4  ;;  %890 = vmatprep.mubr.bf16.mxu1 %v2440_v0 }
 0x6e0   :  { %868 = vmatprep.subr.bf16.mxu1 %v2528_v6 }
 0x6e3   :  { %869 = vmatpush1.bf16.msra.mxu1 %v2536_v8 }
 0x6e4   :  { %870 = vmatprep.subr.bf16.mxu1 %v2545_v10 }
 0x6e7   :  { %871 = vmatpush1.bf16.msra.mxu1 %v2551_v11 }
 0x6e8   :  { %872 = vmatprep.subr.bf16.mxu1 %v2557_v12 }
 0x6eb   :  { %873 = vmatpush1.bf16.msra.mxu1 %v2562_v13 }
 0x6ec   :  { %2085 = vmatprep.subr.bf16.mxu1 %v2441_v15 }
 0x79e   :  { %v640_v60 = vpop.f32.mrf.mxu1 }
 0x79f   :  { %v641_v29 = vadd.f32 %v2697_v33, %v640_v60 }
 0x7a0   :  { %v2067_v35 = vpop.f32.mrf.mxu1 }
 0x7a1   :  { %v646_v36 = vmul.f32 %v641_v29, %v2702_v34 }
 0x7a2   :  { %v643_v20 = vpop.f32.mrf.mxu1 }
 0x7a3   :  { %v1900_v37 = vmul.f32 -1.442695, %v646_v36 }
 0x7a4   :  { %v2068_v38 = vpop.f32.mrf.mxu1 }
 0x7a5   :  { %2243 = vpow2.f32 %v1900_v37 }
 0x7b2   :  { %v2244_v39 = vpop.eup %2243 }
 0x7b3   :  { %v650_v40 = vadd.f32 1.0, %v2244_v39 }
 0x7b5   :  { %2245 = vrcp.f32 %v650_v40 }
 0x7c2   :  { %v2246_v41 = vpop.eup %2245 }
 0x7c3   :  { %v653_v42 = vmul.f32 %v2246_v41, %v2702_v34 }
 0x7c5   :  { %v654_v43 = vadd.f32 %v653_v42, %v2709_v44 }
 0x7c7   :  { %657 = vrot.lane.b32.xlu0 %v654_v43, %s2437_s30  ;;  %v655_v7 = vmul.f32 %v654_v43, %v2715_v54 }
 0x839   :  { %v658_v31 = vpop.permute.xlu0 %657 }
 0x83a   :  { %v660_v46 = vmul.f32 %v658_v31, %v654_v43 }
 0x83c   :  { %662 = vrot.lane.b32.xlu1 %v660_v46, %s2444_s25 }
 0x8ae   :  { %v663_v9 = vpop.permute.xlu1 %662 }
 0x8af   :  { %v2771_v47 = vadd.f32 %v663_v9, %v655_v7 }
 0x8b1   :  { %2247 = vtanh.f32 %v2771_v47 }
 0x8be   :  { %v2248_v48 = vpop.eup %2247 }
 0x8bf   :  { %668 = vrot.lane.b32.xlu0 %v2248_v48, %s2437_s30 }
 0x931   :  { %v669_v49 = vpop.permute.xlu0 %668 }
 0x932   :  { %v2775_v51 = vmul.f32 %v669_v49, %v654_v43 }
 0x934   :  { %v1962_v57 = vpack.c.bf16 %v2775_v51, %v2775_v51 }
 0x936   :  { %676 = vrot.lane.b32.xlu1 %v1962_v57, %s2445_s26 }
 0x9a8   :  { %v677_v62 = vpop.permute.xlu1 %676 }
 0x9a9   :  { %679 = vst.msk [vmem:[#allocation4] sm:$0xf] %vm511_vm10, %v677_v62 }
 0x9b0   :  { %v687_v54 = vld [vmem:[#allocation4] sm:$0xf] }
 0x9b1   :  { %1902 = vmatmul.mubr.msk.bf16.vlgmr.msra.gmra.mxu0 %vm314_vm2, %v687_v54 }
 0x9b2   :  { %2070 = vmatpush3.bf16.msra.mxu0 %v2605_v50  ;;  %2081 = vmatprep.mubr.msk.bf16.mxu0 %vm2443_vm4, %v2441_v15 }
 0x9b3   :  { %2071 = vmatprep.subr.bf16.mxu0 %v2441_v15 }
 0x9b6   :  { %2072 = vmatpush3.bf16.msra.mxu0 %v2611_v52 }
 0x9b7   :  { %2073 = vmatprep.subr.bf16.mxu0 %v2441_v15 }
 0x9ba   :  { %2074 = vmatpush3.bf16.msra.mxu0 %v2617_v53 }
 0x9bb   :  { %2075 = vmatprep.subr.bf16.mxu0 %v2441_v15 }
 0x9be   :  { %2076 = vmatpush3.bf16.msra.mxu0 %v2624_v55 }
 0x9bf   :  { %2077 = vmatprep.subr.bf16.mxu0 %v2441_v15 }
 0x9c2   :  { %2078 = vmatpush3.bf16.msra.mxu0 %v2630_v56 }
 0x9c3   :  { %2079 = vmatprep.subr.bf16.mxu0 %v2441_v15 }
 0x9c6   :  { %2080 = vmatpush3.bf16.msra.mxu0 %v2642_v61 }
 0x9c7   :  { %1033 = vmatprep.subr.bf16.mxu0 %v2510_v2 }
 0xa71   :  { %v725_v1 = vpop.f32.mrf.mxu0 }
 0xa72   :  { %v732_v5 = vadd.f32 %v725_v1, %v180_v63 }
 0xa73   :  { %v727_v60 = vpop.f32.mrf.mxu0 }
 0xa74   :  { %v733_v29 = vadd.f32 %v727_v60, %v182_v3  ;;  %v1903_v35 = vmul.f32 -1.442695, %v732_v5 }
 0xa75   :  { %v729_v36 = vpop.f32.mrf.mxu0 }
 0xa76   :  { %v735_v20 = vmul.f32 %v733_v29, %v2595_v32  ;;  %2249 = vpow2.f32 %v1903_v35 }
 0xa77   :  { %v730_v37 = vpop.f32.mrf.mxu0 }
 0xa78   :  { %v1904_v38 = vmul.f32 -1.442695, %v735_v20 }
 0xa7a   :  { %2251 = vpow2.f32 %v1904_v38 }
 0xa83   :  { %v2250_v39 = vpop.eup %2249 }
 0xa84   :  { %v742_v42 = vadd.f32 1.0, %v2250_v39 }
 0xa87   :  { %v2252_v40 = vpop.eup %2251 }
 0xa88   :  { %v743_v41 = vadd.f32 1.0, %v2252_v40 }
 0xa8a   :  { %2253 = vrcp.f32 %v743_v41 }
 0xa8b   :  { %2255 = vrcp.f32 %v742_v42 }
 0xa97   :  { %v2254_v14 = vpop.eup %2253 }
 0xa98   :  { %v749_v16 = vmul.f32 %v2254_v14, %v2595_v32  ;;  %v2256_v31 = vpop.eup %2255 }
 0xa99   :  { %v752_v7 = vmul.f32 %v2256_v31, %v2749_v58 }
 0xa9a   :  { %v751_v43 = vadd.f32 %v749_v16, %v2600_v45 }
 0xa9c   :  { %v753_v46 = vmul.f32 %v2256_v31, %v751_v43 }
 0xa9e   :  { %755 = vrot.lane.b32.xlu0 %v753_v46, %s2437_s30 }
 0xb10   :  { %v756_v9 = vpop.permute.xlu0 %755 }
 0xb11   :  { %v2805_v48 = vadd.f32 %v756_v9, %v752_v7 }
 0xb13   :  { %2257 = vtanh.f32 %v2805_v48 }
 0xb20   :  { %v2258_v49 = vpop.eup %2257 }
 0xb21   :  { %v760_v57 = vmul.f32 %v2258_v49, %v751_v43  ;;  %v184_v49 = vadd.f32 %v2668_v17, %v2586_v21 }
 0xb23   :  { %v1963_v62 = vpack.c.bf16 %v760_v57, %v760_v57 }
 0xb25   :  { %765 = vrot.lane.b32.xlu1 %v1963_v62, %s2437_s30  ;;  %v186_v62 = vadd.f32 %v2670_v18, %v2590_v26 }
 0xb97   :  { %v766_v54 = vpop.permute.xlu1 %765 }
 0xb98   :  { %768 = vst.msk [vmem:[#allocation4] sm:$0xf] %vm395_vm5, %v766_v54 }
 0xb9f   :  { %v769_v63 = vld [vmem:[#allocation4] sm:$0xf] }
 0xba0   :  { %2082 = vmatmul.mubr.msk.bf16.vlgmr.msra.gmra.mxu0 %vm434_vm6, %v769_v63 }
 0xba1   :  { %1034 = vmatpush1.bf16.msra.mxu0 %v2518_v4  ;;  %1057 = vmatprep.mubr.bf16.mxu0 %v2440_v0 }
 0xba2   :  { %1035 = vmatprep.subr.bf16.mxu0 %v2528_v6 }
 0xba5   :  { %1036 = vmatpush1.bf16.msra.mxu0 %v2536_v8 }
 0xba6   :  { %1037 = vmatprep.subr.bf16.mxu0 %v2545_v10 }
 0xba9   :  { %1038 = vmatpush1.bf16.msra.mxu0 %v2551_v11 }
 0xbaa   :  { %1039 = vmatprep.subr.bf16.mxu0 %v2557_v12 }
 0xbad   :  { %1040 = vmatpush1.bf16.msra.mxu0 %v2562_v13 }
 0xbae   :  { %2101 = vmatprep.subr.bf16.mxu0 %v2441_v15 }
 0xc60   :  { %v807_v58 = vpop.f32.mrf.mxu0 }
 0xc61   :  { %v808_v1 = vadd.f32 %v2697_v33, %v807_v58 }
 0xc62   :  { %v2083_v3 = vpop.f32.mrf.mxu0 }
 0xc63   :  { %v813_v5 = vmul.f32 %v808_v1, %v2702_v34 }
 0xc64   :  { %v810_v60 = vpop.f32.mrf.mxu0 }
 0xc65   :  { %v1907_v29 = vmul.f32 -1.442695, %v813_v5 }
 0xc66   :  { %v2084_v35 = vpop.f32.mrf.mxu0 }
 0xc67   :  { %2259 = vpow2.f32 %v1907_v29 }
 0xc74   :  { %v2260_v36 = vpop.eup %2259 }
 0xc75   :  { %v817_v20 = vadd.f32 1.0, %v2260_v36 }
 0xc77   :  { %2261 = vrcp.f32 %v817_v20 }
 0xc84   :  { %v2262_v37 = vpop.eup %2261 }
 0xc85   :  { %v820_v38 = vmul.f32 %v2262_v37, %v2702_v34 }
 0xc87   :  { %v821_v39 = vadd.f32 %v820_v38, %v2709_v44 }
 0xc89   :  { %824 = vrot.lane.b32.xlu0 %v821_v39, %s2437_s30  ;;  %v822_v42 = vmul.f32 %v821_v39, %v2771_v47 }
 0xcfb   :  { %v825_v40 = vpop.permute.xlu0 %824 }
 0xcfc   :  { %v827_v41 = vmul.f32 %v825_v40, %v821_v39 }
 0xcfe   :  { %829 = vrot.lane.b32.xlu1 %v827_v41, %s2444_s25 }
 0xd70   :  { %v830_v14 = vpop.permute.xlu1 %829 }
 0xd71   :  { %v2827_v16 = vadd.f32 %v830_v14, %v822_v42 }
 0xd73   :  { %2263 = vtanh.f32 %v2827_v16 }
 0xd80   :  { %v2264_v43 = vpop.eup %2263 }
 0xd81   :  { %835 = vrot.lane.b32.xlu0 %v2264_v43, %s2437_s30 }
 0xdf3   :  { %v836_v31 = vpop.permute.xlu0 %835 }
 0xdf4   :  { %v2831_v46 = vmul.f32 %v836_v31, %v821_v39 }
 0xdf6   :  { %v1964_v7 = vpack.c.bf16 %v2831_v46, %v2831_v46 }
 0xdf8   :  { %843 = vrot.lane.b32.xlu1 %v1964_v7, %s2445_s26 }
 0xe6a   :  { %v844_v9 = vpop.permute.xlu1 %843 }
 0xe6b   :  { %846 = vst.msk [vmem:[#allocation4] sm:$0xf] %vm511_vm10, %v844_v9 }
 0xe72   :  { %v854_v47 = vld [vmem:[#allocation4] sm:$0xf] }
 0xe73   :  { %1909 = vmatmul.mubr.msk.bf16.vlgmr.msra.gmra.mxu1 %vm314_vm2, %v854_v47 }
 0xe74   :  { %2086 = vmatpush3.bf16.msra.mxu1 %v2605_v50  ;;  %2097 = vmatprep.mubr.msk.bf16.mxu1 %vm2443_vm4, %v2441_v15 }
 0xe75   :  { %2087 = vmatprep.subr.bf16.mxu1 %v2441_v15 }
 0xe78   :  { %2088 = vmatpush3.bf16.msra.mxu1 %v2611_v52 }
 0xe79   :  { %2089 = vmatprep.subr.bf16.mxu1 %v2441_v15 }
 0xe7c   :  { %2090 = vmatpush3.bf16.msra.mxu1 %v2617_v53 }
 0xe7d   :  { %2091 = vmatprep.subr.bf16.mxu1 %v2441_v15 }
 0xe80   :  { %2092 = vmatpush3.bf16.msra.mxu1 %v2624_v55 }
 0xe81   :  { %2093 = vmatprep.subr.bf16.mxu1 %v2441_v15 }
 0xe84   :  { %2094 = vmatpush3.bf16.msra.mxu1 %v2630_v56 }
 0xe85   :  { %2095 = vmatprep.subr.bf16.mxu1 %v2441_v15 }
 0xe88   :  { %2096 = vmatpush3.bf16.msra.mxu1 %v2642_v61 }
 0xe89   :  { %1200 = vmatprep.subr.bf16.mxu1 %v2510_v2 }
 0xf33   :  { %v892_v57 = vpop.f32.mrf.mxu1 }
 0xf34   :  { %v899_v54 = vadd.f32 %v892_v57, %v184_v49 }
 0xf35   :  { %v894_v63 = vpop.f32.mrf.mxu1 }
 0xf36   :  { %v900_v58 = vadd.f32 %v894_v63, %v186_v62  ;;  %v1910_v1 = vmul.f32 -1.442695, %v899_v54 }
 0xf37   :  { %v896_v3 = vpop.f32.mrf.mxu1 }
 0xf38   :  { %v902_v5 = vmul.f32 %v900_v58, %v2595_v32  ;;  %2265 = vpow2.f32 %v1910_v1 }
 0xf39   :  { %v897_v60 = vpop.f32.mrf.mxu1 }
 0xf3a   :  { %v1911_v29 = vmul.f32 -1.442695, %v902_v5 }
 0xf3c   :  { %2267 = vpow2.f32 %v1911_v29 }
 0xf45   :  { %v2266_v35 = vpop.eup %2265 }
 0xf46   :  { %v909_v37 = vadd.f32 1.0, %v2266_v35 }
 0xf49   :  { %v2268_v36 = vpop.eup %2267 }
 0xf4a   :  { %v910_v20 = vadd.f32 1.0, %v2268_v36 }
 0xf4c   :  { %2269 = vrcp.f32 %v910_v20 }
 0xf4d   :  { %2271 = vrcp.f32 %v909_v37  ;;  %v190_v37 = vadd.f32 %v2672_v19, %v2586_v21 }
 0xf59   :  { %v2270_v17 = vpop.eup %2269 }
 0xf5a   :  { %v916_v18 = vmul.f32 %v2270_v17, %v2595_v32  ;;  %v2272_v39 = vpop.eup %2271 }
 0xf5b   :  { %v919_v41 = vmul.f32 %v2272_v39, %v2805_v48 }
 0xf5c   :  { %v918_v38 = vadd.f32 %v916_v18, %v2600_v45  ;;  %v192_v18 = vadd.f32 %v2674_v22, %v2590_v26 }
 0xf5e   :  { %v920_v40 = vmul.f32 %v2272_v39, %v918_v38 }
 0xf60   :  { %922 = vrot.lane.b32.xlu0 %v920_v40, %s2437_s30 }
 0xfd2   :  { %v923_v42 = vpop.permute.xlu0 %922 }
 0xfd3   :  { %v2861_v14 = vadd.f32 %v923_v42, %v919_v41 }
 0xfd5   :  { %2273 = vtanh.f32 %v2861_v14 }
 0xfe2   :  { %v2274_v43 = vpop.eup %2273 }
 0xfe3   :  { %v927_v31 = vmul.f32 %v2274_v43, %v918_v38 }
 0xfe5   :  { %v1965_v7 = vpack.c.bf16 %v927_v31, %v927_v31 }
 0xfe7   :  { %932 = vrot.lane.b32.xlu1 %v1965_v7, %s2437_s30 }
0x1059   :  { %v933_v9 = vpop.permute.xlu1 %932 }
0x105a   :  { %935 = vst.msk [vmem:[#allocation4] sm:$0xf] %vm395_vm5, %v933_v9 }
0x1061   :  { %v936_v47 = vld [vmem:[#allocation4] sm:$0xf] }
0x1062   :  { %2098 = vmatmul.mubr.msk.bf16.vlgmr.msra.gmra.mxu1 %vm434_vm6, %v936_v47 }
0x1063   :  { %1201 = vmatpush1.bf16.msra.mxu1 %v2518_v4  ;;  %1224 = vmatprep.mubr.bf16.mxu1 %v2440_v0 }
0x1064   :  { %1202 = vmatprep.subr.bf16.mxu1 %v2528_v6 }
0x1067   :  { %1203 = vmatpush1.bf16.msra.mxu1 %v2536_v8 }
0x1068   :  { %1204 = vmatprep.subr.bf16.mxu1 %v2545_v10 }
0x106b   :  { %1205 = vmatpush1.bf16.msra.mxu1 %v2551_v11 }
0x106c   :  { %1206 = vmatprep.subr.bf16.mxu1 %v2557_v12 }
0x106f   :  { %1207 = vmatpush1.bf16.msra.mxu1 %v2562_v13 }
0x1070   :  { %2117 = vmatprep.subr.bf16.mxu1 %v2441_v15 }
0x1122   :  { %v974_v48 = vpop.f32.mrf.mxu1 }
0x1123   :  { %v975_v49 = vadd.f32 %v2697_v33, %v974_v48 }
0x1124   :  { %v2099_v4 = vpop.f32.mrf.mxu1 }
0x1125   :  { %v980_v57 = vmul.f32 %v975_v49, %v2702_v34 }
0x1126   :  { %v977_v62 = vpop.f32.mrf.mxu1 }
0x1127   :  { %v1914_v6 = vmul.f32 -1.442695, %v980_v57 }
0x1128   :  { %v2100_v54 = vpop.f32.mrf.mxu1 }
0x1129   :  { %2275 = vpow2.f32 %v1914_v6 }
0x1136   :  { %v2276_v8 = vpop.eup %2275 }
0x1137   :  { %v984_v10 = vadd.f32 1.0, %v2276_v8 }
0x1139   :  { %2277 = vrcp.f32 %v984_v10 }
0x1146   :  { %v2278_v11 = vpop.eup %2277 }
0x1147   :  { %v987_v12 = vmul.f32 %v2278_v11, %v2702_v34 }
0x1149   :  { %v988_v13 = vadd.f32 %v987_v12, %v2709_v44 }
0x114b   :  { %991 = vrot.lane.b32.xlu0 %v988_v13, %s2437_s30  ;;  %v989_v1 = vmul.f32 %v988_v13, %v2827_v16 }
0x11bd   :  { %v992_v63 = vpop.permute.xlu0 %991 }
0x11be   :  { %v994_v58 = vmul.f32 %v992_v63, %v988_v13  ;;  %v2933_v63 = vld [vmem:[%s3197_s2 + $0x24] ss:$8 sps:$4 sm:$0xff]  }
0x11c0   :  { %996 = vrot.lane.b32.xlu1 %v994_v58, %s2444_s25  ;;  %v2939_v58 = vld [vmem:[%s3197_s2 + $0x20] ss:$8 sps:$4 sm:$0xff]  }
0x1232   :  { %v997_v3 = vpop.permute.xlu1 %996 }
0x1233   :  { %v2883_v5 = vadd.f32 %v997_v3, %v989_v1  ;;  %v2945_v1 = vld [vmem:[%s3197_s2 + $0x14] ss:$8 sps:$4 sm:$0xff]   ;;  %v2951_v3 = vld [vmem:[%s3197_s2 + $0x10] ss:$8 sps:$4 sm:$0xff]  }
0x1235   :  { %2279 = vtanh.f32 %v2883_v5 }
0x1242   :  { %v2280_v60 = vpop.eup %2279 }
0x1243   :  { %1002 = vrot.lane.b32.xlu0 %v2280_v60, %s2437_s30  ;;  %v2957_v60 = vld [vmem:[%s3197_s2 + $0x4] ss:$8 sps:$4 sm:$0xff]  }
0x12b5   :  { %v1003_v29 = vpop.permute.xlu0 %1002 }
0x12b6   :  { %v2887_v35 = vmul.f32 %v1003_v29, %v988_v13  ;;  %v2963_v29 = vld [vmem:[%s3197_s2] ss:$8 sps:$4 sm:$0xff]  }
0x12b8   :  { %v1966_v36 = vpack.c.bf16 %v2887_v35, %v2887_v35 }
0x12ba   :  { %1010 = vrot.lane.b32.xlu1 %v1966_v36, %s2445_s26 }
0x132c   :  { %v1011_v20 = vpop.permute.xlu1 %1010 }
0x132d   :  { %1013 = vst.msk [vmem:[#allocation4] sm:$0xf] %vm511_vm10, %v1011_v20 }
0x1334   :  { %v1021_v16 = vld [vmem:[#allocation4] sm:$0xf] }
0x1335   :  { %1916 = vmatmul.mubr.msk.bf16.vlgmr.msra.gmra.mxu0 %vm314_vm2, %v1021_v16 }
0x1336   :  { %2102 = vmatpush3.bf16.msra.mxu0 %v2605_v50  ;;  %2113 = vmatprep.mubr.msk.bf16.mxu0 %vm2443_vm4, %v2441_v15 }
0x1337   :  { %2103 = vmatprep.subr.bf16.mxu0 %v2441_v15 }
0x133a   :  { %2104 = vmatpush3.bf16.msra.mxu0 %v2611_v52 }
0x133b   :  { %2105 = vmatprep.subr.bf16.mxu0 %v2441_v15 }
0x133e   :  { %2106 = vmatpush3.bf16.msra.mxu0 %v2617_v53 }
0x133f   :  { %2107 = vmatprep.subr.bf16.mxu0 %v2441_v15 }
0x1342   :  { %2108 = vmatpush3.bf16.msra.mxu0 %v2624_v55 }
0x1343   :  { %2109 = vmatprep.subr.bf16.mxu0 %v2441_v15 }
0x1346   :  { %2110 = vmatpush3.bf16.msra.mxu0 %v2630_v56 }
0x1347   :  { %2111 = vmatprep.subr.bf16.mxu0 %v2441_v15 }
0x134a   :  { %2112 = vmatpush3.bf16.msra.mxu0 %v2642_v61 }
0x134b   :  { %1367 = vmatprep.subr.bf16.mxu0 %v2510_v2 }
0x13f5   :  { %v1059_v17 = vpop.f32.mrf.mxu0 }
0x13f6   :  { %v1066_v38 = vadd.f32 %v1059_v17, %v190_v37 }
0x13f7   :  { %v1061_v39 = vpop.f32.mrf.mxu0 }
0x13f8   :  { %v1067_v40 = vadd.f32 %v1061_v39, %v192_v18  ;;  %v1917_v41 = vmul.f32 -1.442695, %v1066_v38 }
0x13f9   :  { %v1063_v42 = vpop.f32.mrf.mxu0 }
0x13fa   :  { %v1069_v43 = vmul.f32 %v1067_v40, %v2595_v32  ;;  %2281 = vpow2.f32 %v1917_v41 }
0x13fb   :  { %v1064_v31 = vpop.f32.mrf.mxu0 }
0x13fc   :  { %v1918_v7 = vmul.f32 -1.442695, %v1069_v43 }
0x13fe   :  { %2283 = vpow2.f32 %v1918_v7 }
0x1407   :  { %v2282_v9 = vpop.eup %2281 }
0x1408   :  { %v1076_v48 = vadd.f32 1.0, %v2282_v9 }
0x140b   :  { %v2284_v2 = vpop.eup %2283 }
0x140c   :  { %v1077_v47 = vadd.f32 1.0, %v2284_v2 }
0x140e   :  { %2285 = vrcp.f32 %v1077_v47 }
0x140f   :  { %2287 = vrcp.f32 %v1076_v48 }
0x141b   :  { %v2286_v19 = vpop.eup %2285 }
0x141c   :  { %v1083_v22 = vmul.f32 %v2286_v19, %v2595_v32  ;;  %v2288_v4 = vpop.eup %2287 }
0x141d   :  { %v1086_v62 = vmul.f32 %v2288_v4, %v2861_v14  ;;  %v2926_v14 = vld [vmem:[%s3197_s2 + $0x30] ss:$8 sps:$4 sm:$0xff]  }
0x141e   :  { %v1085_v49 = vadd.f32 %v1083_v22, %v2600_v45 }
0x1420   :  { %v1087_v57 = vmul.f32 %v2288_v4, %v1085_v49 }
0x1422   :  { %1089 = vrot.lane.b32.xlu0 %v1087_v57, %s2437_s30 }
0x1494   :  { %v1090_v6 = vpop.permute.xlu0 %1089 }
0x1495   :  { %v2917_v54 = vadd.f32 %v1090_v6, %v1086_v62 }
0x1497   :  { %2289 = vtanh.f32 %v2917_v54 }
0x14a4   :  { %v2290_v8 = vpop.eup %2289 }
0x14a5   :  { %v1094_v10 = vmul.f32 %v2290_v8, %v1085_v49 }
0x14a7   :  { %v1967_v11 = vpack.c.bf16 %v1094_v10, %v1094_v10 }
0x14a9   :  { %1099 = vrot.lane.b32.xlu1 %v1967_v11, %s2437_s30 }
0x151b   :  { %v1100_v12 = vpop.permute.xlu1 %1099 }
0x151c   :  { %1102 = vst.msk [vmem:[#allocation4] sm:$0xf] %vm395_vm5, %v1100_v12 }
0x1523   :  { %v1103_v13 = vld [vmem:[#allocation4] sm:$0xf] }
0x1524   :  { %2114 = vmatmul.mubr.msk.bf16.vlgmr.msra.gmra.mxu0 %vm434_vm6, %v1103_v13 }
0x1525   :  { %1368 = vmatpush1.bf16.msra.mxu0 %v2926_v14  ;;  %1391 = vmatprep.mubr.bf16.mxu0 %v2440_v0 }
0x1526   :  { %1369 = vmatprep.subr.bf16.mxu0 %v2933_v63 }
0x1529   :  { %1370 = vmatpush1.bf16.msra.mxu0 %v2939_v58 }
0x152a   :  { %1371 = vmatprep.subr.bf16.mxu0 %v2945_v1 }
0x152d   :  { %1372 = vmatpush1.bf16.msra.mxu0 %v2951_v3 }
0x152e   :  { %1373 = vmatprep.subr.bf16.mxu0 %v2957_v60 }
0x1531   :  { %1374 = vmatpush1.bf16.msra.mxu0 %v2963_v29 }
0x1532   :  { %2133 = vmatprep.subr.bf16.mxu0 %v2441_v15 }
0x15e4   :  { %v1141_v36 = vpop.f32.mrf.mxu0 }
0x15e5   :  { %v1142_v20 = vadd.f32 %v2697_v33, %v1141_v36 }
0x15e6   :  { %v2115_v16 = vpop.f32.mrf.mxu0 }
0x15e7   :  { %v1147_v37 = vmul.f32 %v1142_v20, %v2702_v34 }
0x15e8   :  { %v1144_v17 = vpop.f32.mrf.mxu0 }
0x15e9   :  { %v1921_v18 = vmul.f32 -1.442695, %v1147_v37 }
0x15ea   :  { %v2116_v38 = vpop.f32.mrf.mxu0 }
0x15eb   :  { %2291 = vpow2.f32 %v1921_v18 }
0x15f8   :  { %v2292_v39 = vpop.eup %2291 }
0x15f9   :  { %v1151_v40 = vadd.f32 1.0, %v2292_v39 }
0x15fb   :  { %2293 = vrcp.f32 %v1151_v40 }
0x1608   :  { %v2294_v41 = vpop.eup %2293 }
0x1609   :  { %v1154_v42 = vmul.f32 %v2294_v41, %v2702_v34 }
0x160b   :  { %v1155_v43 = vadd.f32 %v1154_v42, %v2709_v44 }
0x160d   :  { %1158 = vrot.lane.b32.xlu0 %v1155_v43, %s2437_s30  ;;  %v1156_v9 = vmul.f32 %v1155_v43, %v2883_v5 }
0x167f   :  { %v1159_v31 = vpop.permute.xlu0 %1158 }
0x1680   :  { %v1161_v7 = vmul.f32 %v1159_v31, %v1155_v43 }
0x1682   :  { %1163 = vrot.lane.b32.xlu1 %v1161_v7, %s2444_s25 }
0x16f4   :  { %v1164_v2 = vpop.permute.xlu1 %1163 }
0x16f5   :  { %v2974_v47 = vadd.f32 %v1164_v2, %v1156_v9 }
0x16f7   :  { %2295 = vtanh.f32 %v2974_v47 }
0x1704   :  { %v2296_v48 = vpop.eup %2295 }
0x1705   :  { %1169 = vrot.lane.b32.xlu0 %v2296_v48, %s2437_s30 }
0x1777   :  { %v1170_v19 = vpop.permute.xlu0 %1169 }
0x1778   :  { %v2978_v22 = vmul.f32 %v1170_v19, %v1155_v43 }
0x177a   :  { %v1968_v49 = vpack.c.bf16 %v2978_v22, %v2978_v22 }
0x177c   :  { %1177 = vrot.lane.b32.xlu1 %v1968_v49, %s2445_s26 }
0x17ee   :  { %v1178_v4 = vpop.permute.xlu1 %1177 }
0x17ef   :  { %1180 = vst.msk [vmem:[#allocation4] sm:$0xf] %vm511_vm10, %v1178_v4 }
0x17f6   :  { %v1188_v5 = vld [vmem:[#allocation4] sm:$0xf] }
0x17f7   :  { %1923 = vmatmul.mubr.msk.bf16.vlgmr.msra.gmra.mxu1 %vm314_vm2, %v1188_v5 }
0x17f8   :  { %2118 = vmatpush3.bf16.msra.mxu1 %v2605_v50  ;;  %2129 = vmatprep.mubr.msk.bf16.mxu1 %vm2443_vm4, %v2441_v15  ;;  %v2384_v50 = vld [vmem:[%s3197_s2 + $0x34] ss:$8 sps:$4 sm:$0xff]  }
0x17f9   :  { %2119 = vmatprep.subr.bf16.mxu1 %v2441_v15 }
0x17fc   :  { %2120 = vmatpush3.bf16.msra.mxu1 %v2611_v52  ;;  %v194_v52 = vadd.f32 %v2676_v23, %v2586_v21 }
0x17fd   :  { %2121 = vmatprep.subr.bf16.mxu1 %v2441_v15 }
0x1800   :  { %2122 = vmatpush3.bf16.msra.mxu1 %v2617_v53 }
0x1801   :  { %2123 = vmatprep.subr.bf16.mxu1 %v2441_v15 }
0x1804   :  { %2124 = vmatpush3.bf16.msra.mxu1 %v2624_v55  ;;  %v196_v55 = vadd.f32 %v2678_v24, %v2590_v26 }
0x1805   :  { %2125 = vmatprep.subr.bf16.mxu1 %v2441_v15 }
0x1808   :  { %2126 = vmatpush3.bf16.msra.mxu1 %v2630_v56 }
0x1809   :  { %2127 = vmatprep.subr.bf16.mxu1 %v2441_v15 }
0x180c   :  { %2128 = vmatpush3.bf16.msra.mxu1 %v2642_v61 }
0x180d   :  { %1534 = vmatprep.subr.bf16.mxu1 %v2384_v50 }
0x18b7   :  { %v1226_v53 = vpop.f32.mrf.mxu1 }
0x18b8   :  { %v1233_v57 = vadd.f32 %v1226_v53, %v194_v52 }
0x18b9   :  { %v1228_v62 = vpop.f32.mrf.mxu1 }
0x18ba   :  { %v1234_v6 = vadd.f32 %v1228_v62, %v196_v55  ;;  %v1924_v56 = vmul.f32 -1.442695, %v1233_v57  ;;  %v3043_v57 = vld [vmem:[#allocation5 + $0x28] sm:$0xff]   ;;  %v3049_v62 = vld [vmem:[#allocation5 + $0x20] sm:$0xff]  }
0x18bb   :  { %v1230_v8 = vpop.f32.mrf.mxu1 }
0x18bc   :  { %v1236_v10 = vmul.f32 %v1234_v6, %v2595_v32  ;;  %2297 = vpow2.f32 %v1924_v56  ;;  %v3053_v6 = vld [vmem:[#allocation5 + $0x18] sm:$0xff]   ;;  %v3057_v56 = vld [vmem:[#allocation5 + $0x10] sm:$0xff]   ;;  %v3061_v8 = vld [vmem:[#allocation5 + $0x8] sm:$0xff]  }
0x18bd   :  { %v1231_v61 = vpop.f32.mrf.mxu1 }
0x18be   :  { %v1925_v11 = vmul.f32 -1.442695, %v1236_v10  ;;  %v3065_v10 = vld [vmem:[#allocation5] sm:$0xff]   ;;  %v200_v61 = vadd.f32 %v2680_v25, %v2586_v21 }
0x18c0   :  { %2299 = vpow2.f32 %v1925_v11 }
0x18c9   :  { %v2298_v12 = vpop.eup %2297 }
0x18ca   :  { %v1243_v20 = vadd.f32 1.0, %v2298_v12  ;;  %v202_v12 = vadd.f32 %v2682_v27, %v2590_v26 }
0x18cd   :  { %v2300_v13 = vpop.eup %2299 }
0x18ce   :  { %v1244_v36 = vadd.f32 1.0, %v2300_v13 }
0x18d0   :  { %2301 = vrcp.f32 %v1244_v36 }
0x18d1   :  { %2303 = vrcp.f32 %v1243_v20 }
0x18dd   :  { %v2302_v23 = vpop.eup %2301 }
0x18de   :  { %v1250_v24 = vmul.f32 %v2302_v23, %v2595_v32  ;;  %v2304_v37 = vpop.eup %2303 }
0x18df   :  { %v1253_v18 = vmul.f32 %v2304_v37, %v2917_v54 }
0x18e0   :  { %v1252_v16 = vadd.f32 %v1250_v24, %v2600_v45 }
0x18e2   :  { %v1254_v17 = vmul.f32 %v2304_v37, %v1252_v16 }
0x18e4   :  { %1256 = vrot.lane.b32.xlu0 %v1254_v17, %s2437_s30 }
0x1956   :  { %v1257_v38 = vpop.permute.xlu0 %1256 }
0x1957   :  { %v3010_v39 = vadd.f32 %v1257_v38, %v1253_v18 }
0x1959   :  { %2305 = vtanh.f32 %v3010_v39 }
0x1966   :  { %v2306_v40 = vpop.eup %2305 }
0x1967   :  { %v1261_v41 = vmul.f32 %v2306_v40, %v1252_v16 }
0x1969   :  { %v1969_v42 = vpack.c.bf16 %v1261_v41, %v1261_v41 }
0x196b   :  { %1266 = vrot.lane.b32.xlu1 %v1969_v42, %s2437_s30 }
0x19dd   :  { %v1267_v43 = vpop.permute.xlu1 %1266 }
0x19de   :  { %1269 = vst.msk [vmem:[#allocation4] sm:$0xf] %vm395_vm5, %v1267_v43 }
0x19e5   :  { %v1270_v31 = vld [vmem:[#allocation4] sm:$0xf] }
0x19e6   :  { %2130 = vmatmul.mubr.msk.bf16.vlgmr.msra.gmra.mxu1 %vm434_vm6, %v1270_v31 }
0x19e7   :  { %1535 = vmatpush1.bf16.msra.mxu1 %v2926_v14  ;;  %1558 = vmatprep.mubr.bf16.mxu1 %v2440_v0 }
0x19e8   :  { %1536 = vmatprep.subr.bf16.mxu1 %v2933_v63 }
0x19eb   :  { %1537 = vmatpush1.bf16.msra.mxu1 %v2939_v58 }
0x19ec   :  { %1538 = vmatprep.subr.bf16.mxu1 %v2945_v1 }
0x19ef   :  { %1539 = vmatpush1.bf16.msra.mxu1 %v2951_v3 }
0x19f0   :  { %1540 = vmatprep.subr.bf16.mxu1 %v2957_v60 }
0x19f3   :  { %1541 = vmatpush1.bf16.msra.mxu1 %v2963_v29 }
0x19f4   :  { %2149 = vmatprep.subr.bf16.mxu1 %v2441_v15 }
0x1aa6   :  { %v1308_v54 = vpop.f32.mrf.mxu1 }
0x1aa7   :  { %v1309_v7 = vadd.f32 %v2697_v33, %v1308_v54 }
0x1aa8   :  { %v2131_v14 = vpop.f32.mrf.mxu1 }
0x1aa9   :  { %v1314_v0 = vmul.f32 %v1309_v7, %v2702_v34 }
0x1aaa   :  { %v1311_v9 = vpop.f32.mrf.mxu1 }
0x1aab   :  { %v1928_v63 = vmul.f32 -1.442695, %v1314_v0 }
0x1aac   :  { %v2132_v2 = vpop.f32.mrf.mxu1 }
0x1aad   :  { %2307 = vpow2.f32 %v1928_v63 }
0x1aba   :  { %v2308_v58 = vpop.eup %2307 }
0x1abb   :  { %v1318_v1 = vadd.f32 1.0, %v2308_v58 }
0x1abd   :  { %2309 = vrcp.f32 %v1318_v1 }
0x1aca   :  { %v2310_v3 = vpop.eup %2309 }
0x1acb   :  { %v1321_v60 = vmul.f32 %v2310_v3, %v2702_v34 }
0x1acd   :  { %v1322_v29 = vadd.f32 %v1321_v60, %v2709_v44 }
0x1acf   :  { %1325 = vrot.lane.b32.xlu0 %v1322_v29, %s2437_s30  ;;  %v1323_v33 = vmul.f32 %v1322_v29, %v2974_v47 }
0x1b41   :  { %v1326_v48 = vpop.permute.xlu0 %1325 }
0x1b42   :  { %v1328_v19 = vmul.f32 %v1326_v48, %v1322_v29 }
0x1b44   :  { %1330 = vrot.lane.b32.xlu1 %v1328_v19, %s2444_s25 }
0x1bb6   :  { %v1331_v49 = vpop.permute.xlu1 %1330 }
0x1bb7   :  { %v3032_v4 = vadd.f32 %v1331_v49, %v1323_v33 }
0x1bb9   :  { %2311 = vtanh.f32 %v3032_v4 }
0x1bc6   :  { %v2312_v5 = vpop.eup %2311 }
0x1bc7   :  { %1336 = vrot.lane.b32.xlu0 %v2312_v5, %s2437_s30 }
0x1c39   :  { %v1337_v50 = vpop.permute.xlu0 %1336 }
0x1c3a   :  { %v3036_v52 = vmul.f32 %v1337_v50, %v1322_v29 }
0x1c3c   :  { %v1970_v53 = vpack.c.bf16 %v3036_v52, %v3036_v52 }
0x1c3e   :  { %1344 = vrot.lane.b32.xlu1 %v1970_v53, %s2445_s26 }
0x1cb0   :  { %v1345_v55 = vpop.permute.xlu1 %1344 }
0x1cb1   :  { %1347 = vst.msk [vmem:[#allocation4] sm:$0xf] %vm511_vm10, %v1345_v55 }
0x1cb8   :  { %v1355_v47 = vld [vmem:[#allocation4] sm:$0xf] }
0x1cb9   :  { %1930 = vmatmul.mubr.msk.bf16.vlgmr.msra.gmra.mxu0 %vm314_vm2, %v1355_v47 }
0x1cba   :  { %2134 = vmatpush3.bf16.msra.mxu0 %v3043_v57  ;;  %2145 = vmatprep.mubr.msk.bf16.mxu0 %vm2443_vm4, %v2441_v15 }
0x1cbb   :  { %2135 = vmatprep.subr.bf16.mxu0 %v2441_v15 }
0x1cbe   :  { %2136 = vmatpush3.bf16.msra.mxu0 %v3049_v62 }
0x1cbf   :  { %2137 = vmatprep.subr.bf16.mxu0 %v2441_v15 }
0x1cc2   :  { %2138 = vmatpush3.bf16.msra.mxu0 %v3053_v6 }
0x1cc3   :  { %2139 = vmatprep.subr.bf16.mxu0 %v2441_v15 }
0x1cc6   :  { %2140 = vmatpush3.bf16.msra.mxu0 %v3057_v56 }
0x1cc7   :  { %2141 = vmatprep.subr.bf16.mxu0 %v2441_v15 }
0x1cca   :  { %2142 = vmatpush3.bf16.msra.mxu0 %v3061_v8 }
0x1ccb   :  { %2143 = vmatprep.subr.bf16.mxu0 %v2441_v15 }
0x1cce   :  { %2144 = vmatpush3.bf16.msra.mxu0 %v3065_v10 }
0x1d79   :  { %v1393_v11 = vpop.f32.mrf.mxu0 }
0x1d7a   :  { %v1400_v13 = vadd.f32 %v1393_v11, %v200_v61 }
0x1d7b   :  { %v1395_v36 = vpop.f32.mrf.mxu0 }
0x1d7c   :  { %v1401_v20 = vadd.f32 %v1395_v36, %v202_v12  ;;  %v1931_v23 = vmul.f32 -1.442695, %v1400_v13 }
0x1d7d   :  { %v1397_v24 = vpop.f32.mrf.mxu0 }
0x1d7e   :  { %v1403_v16 = vmul.f32 %v1401_v20, %v2595_v32  ;;  %2313 = vpow2.f32 %v1931_v23 }
0x1d7f   :  { %v1398_v37 = vpop.f32.mrf.mxu0 }
0x1d80   :  { %v1932_v17 = vmul.f32 -1.442695, %v1403_v16  ;;  %v206_v37 = vadd.f32 %v2692_v30, %v2590_v26 }
0x1d82   :  { %2315 = vpow2.f32 %v1932_v17 }
0x1d8b   :  { %v2314_v18 = vpop.eup %2313 }
0x1d8c   :  { %v1410_v41 = vadd.f32 1.0, %v2314_v18 }
0x1d8f   :  { %v2316_v38 = vpop.eup %2315 }
0x1d90   :  { %v1411_v40 = vadd.f32 1.0, %v2316_v38 }
0x1d92   :  { %2317 = vrcp.f32 %v1411_v40 }
0x1d93   :  { %2319 = vrcp.f32 %v1410_v41 }
0x1d9f   :  { %v2318_v25 = vpop.eup %2317 }
0x1da0   :  { %v1417_v27 = vmul.f32 %v2318_v25, %v2595_v32  ;;  %v2320_v43 = vpop.eup %2319 }
0x1da1   :  { %v1420_v54 = vmul.f32 %v2320_v43, %v3010_v39  ;;  %v3086_v39 = vld [vmem:[%s3200_s5] ss:$0 sm:$0xff] }
0x1da2   :  { %v1419_v42 = vadd.f32 %v1417_v27, %v2600_v45 }
0x1da4   :  { %v1421_v31 = vmul.f32 %v2320_v43, %v1419_v42 }
0x1da6   :  { %1423 = vrot.lane.b32.xlu0 %v1421_v31, %s2437_s30 }
0x1e18   :  { %v1424_v7 = vpop.permute.xlu0 %1423 }
0x1e19   :  { %v3077_v14 = vadd.f32 %v1424_v7, %v1420_v54 }
0x1e1b   :  { %2321 = vtanh.f32 %v3077_v14 }
0x1e28   :  { %v2322_v0 = vpop.eup %2321 }
0x1e29   :  { %v1428_v9 = vmul.f32 %v2322_v0, %v1419_v42 }
0x1e2b   :  { %v1971_v63 = vpack.c.bf16 %v1428_v9, %v1428_v9 }
0x1e2d   :  { %1433 = vrot.lane.b32.xlu1 %v1971_v63, %s2437_s30 }
0x1e9f   :  { %v1434_v2 = vpop.permute.xlu1 %1433 }
0x1ea0   :  { %1436 = vst.msk [vmem:[#allocation4] sm:$0xf] %vm395_vm5, %v1434_v2 }
0x1ea7   :  { %v1437_v58 = vld [vmem:[#allocation4] sm:$0xf] }
0x1ea8   :  { %2146 = vmatmul.mubr.msk.bf16.vlgmr.msra.gmra.mxu0 %vm434_vm6, %v1437_v58 }
0x1f68   :  { %v1475_v1 = vpop.f32.mrf.mxu0 }
0x1f69   :  { %v1476_v3 = vadd.f32 %v3086_v39, %v1475_v1 }
0x1f6a   :  { %v2147_v60 = vpop.f32.mrf.mxu0 }
0x1f6b   :  { %v1481_v29 = vmul.f32 %v1476_v3, %v2702_v34 }
0x1f6c   :  { %v1478_v48 = vpop.f32.mrf.mxu0 }
0x1f6d   :  { %v1935_v19 = vmul.f32 -1.442695, %v1481_v29 }
0x1f6e   :  { %v2148_v33 = vpop.f32.mrf.mxu0 }
0x1f6f   :  { %2323 = vpow2.f32 %v1935_v19 }
0x1f7c   :  { %v2324_v49 = vpop.eup %2323 }
0x1f7d   :  { %v1485_v5 = vadd.f32 1.0, %v2324_v49 }
0x1f7f   :  { %2325 = vrcp.f32 %v1485_v5 }
0x1f8c   :  { %v2326_v50 = vpop.eup %2325 }
0x1f8d   :  { %v1488_v53 = vmul.f32 %v2326_v50, %v2702_v34 }
0x1f8f   :  { %v1489_v55 = vadd.f32 %v1488_v53, %v2709_v44 }
0x1f91   :  { %1492 = vrot.lane.b32.xlu0 %v1489_v55, %s2437_s30  ;;  %v1490_v11 = vmul.f32 %v1489_v55, %v3032_v4 }
0x2003   :  { %v1493_v47 = vpop.permute.xlu0 %1492 }
0x2004   :  { %v1495_v61 = vmul.f32 %v1493_v47, %v1489_v55  ;;  %v2215_v47 = vld [vmem:[#allocation7 + $0x8] sm:$0xff]  }
0x2005   :  { %2165 = vmatprep.subr.bf16.mxu0 %v2215_v47 }
0x2006   :  { %1497 = vrot.lane.b32.xlu1 %v1495_v61, %s2444_s25  ;;  %2166 = vmatpush3.bf16.msra.mxu0 %v2215_v47  ;;  %v2216_v61 = vld [vmem:[#allocation7] sm:$0xff]  }
0x2007   :  { %2167 = vmatprep.subr.bf16.mxu0 %v2216_v61 }
0x200a   :  { %2168 = vmatpush3.bf16.msra.mxu0 %v2216_v61 }
0x2078   :  { %v1498_v12 = vpop.permute.xlu1 %1497 }
0x2079   :  { %v3095_v13 = vadd.f32 %v1498_v12, %v1490_v11 }
0x207b   :  { %2327 = vtanh.f32 %v3095_v13 }
0x2088   :  { %v2328_v36 = vpop.eup %2327 }
0x2089   :  { %1503 = vrot.lane.b32.xlu0 %v2328_v36, %s2437_s30 }
0x20fb   :  { %v1504_v20 = vpop.permute.xlu0 %1503 }
0x20fc   :  { %v3099_v23 = vmul.f32 %v1504_v20, %v1489_v55 }
0x20fe   :  { %v1972_v24 = vpack.c.bf16 %v3099_v23, %v3099_v23 }
0x2100   :  { %1511 = vrot.lane.b32.xlu1 %v1972_v24, %s2445_s26 }
0x2172   :  { %v1512_v16 = vpop.permute.xlu1 %1511 }
0x2173   :  { %1514 = vst.msk [vmem:[#allocation4] sm:$0xf] %vm511_vm10, %v1512_v16 }
0x217a   :  { %v1522_v4 = vld [vmem:[#allocation4] sm:$0xf] }
0x217b   :  { %1937 = vmatmul.mubr.msk.bf16.vlgmr.msra.gmra.mxu1 %vm314_vm2, %v1522_v4 }
0x217c   :  { %2150 = vmatpush3.bf16.msra.mxu1 %v3043_v57  ;;  %2161 = vmatprep.mubr.msk.bf16.mxu1 %vm2443_vm4, %v2441_v15  ;;  %v204_v57 = vadd.f32 %v2684_v28, %v2586_v21 }
0x217d   :  { %2151 = vmatprep.subr.bf16.mxu1 %v2441_v15 }
0x2180   :  { %2152 = vmatpush3.bf16.msra.mxu1 %v3049_v62 }
0x2181   :  { %2153 = vmatprep.subr.bf16.mxu1 %v2441_v15 }
0x2184   :  { %2154 = vmatpush3.bf16.msra.mxu1 %v3053_v6 }
0x2185   :  { %2155 = vmatprep.subr.bf16.mxu1 %v2441_v15 }
0x2188   :  { %2156 = vmatpush3.bf16.msra.mxu1 %v3057_v56 }
0x2189   :  { %2157 = vmatprep.subr.bf16.mxu1 %v2441_v15 }
0x218c   :  { %2158 = vmatpush3.bf16.msra.mxu1 %v3061_v8 }
0x218d   :  { %2159 = vmatprep.subr.bf16.mxu1 %v2441_v15 }
0x2190   :  { %2160 = vmatpush3.bf16.msra.mxu1 %v3065_v10 }
0x223b   :  { %v1560_v62 = vpop.f32.mrf.mxu1 }
0x223c   :  { %v1567_v6 = vadd.f32 %v1560_v62, %v204_v57 }
0x223d   :  { %v1562_v17 = vpop.f32.mrf.mxu1 }
0x223e   :  { %v1568_v18 = vadd.f32 %v1562_v17, %v206_v37  ;;  %v1938_v38 = vmul.f32 -1.442695, %v1567_v6 }
0x223f   :  { %v1564_v56 = vpop.f32.mrf.mxu1 }
0x2240   :  { %v1570_v40 = vmul.f32 %v1568_v18, %v2595_v32  ;;  %2329 = vpow2.f32 %v1938_v38 }
0x2241   :  { %v1565_v41 = vpop.f32.mrf.mxu1 }
0x2242   :  { %v1939_v8 = vmul.f32 -1.442695, %v1570_v40  ;;  %v1944_v40 = vld [vmem:[%s3202_s7] ss:$0 sm:$0xff] }
0x2244   :  { %2331 = vpow2.f32 %v1939_v8 }
0x224d   :  { %v2330_v15 = vpop.eup %2329 }
0x224e   :  { %v1577_v27 = vadd.f32 1.0, %v2330_v15 }
0x2251   :  { %v2332_v10 = vpop.eup %2331 }
0x2252   :  { %v1578_v25 = vadd.f32 1.0, %v2332_v10 }
0x2254   :  { %2333 = vrcp.f32 %v1578_v25 }
0x2255   :  { %2335 = vrcp.f32 %v1577_v27 }
0x2261   :  { %v2334_v21 = vpop.eup %2333 }
0x2262   :  { %v1584_v26 = vmul.f32 %v2334_v21, %v2595_v32  ;;  %v2336_v30 = vpop.eup %2335 }
0x2263   :  { %v1587_v43 = vmul.f32 %v2336_v30, %v3077_v14 }
0x2264   :  { %v1586_v28 = vadd.f32 %v1584_v26, %v2600_v45 }
0x2266   :  { %v1588_v42 = vmul.f32 %v2336_v30, %v1586_v28 }
0x2268   :  { %1590 = vrot.lane.b32.xlu0 %v1588_v42, %s2437_s30 }
0x22da   :  { %v1591_v31 = vpop.permute.xlu0 %1590 }
0x22db   :  { %v1593_v54 = vadd.f32 %v1591_v31, %v1587_v43 }
0x22dd   :  { %2337 = vtanh.f32 %v1593_v54 }
0x22ea   :  { %v2338_v7 = vpop.eup %2337 }
0x22eb   :  { %v1595_v0 = vmul.f32 %v2338_v7, %v1586_v28 }
0x22ed   :  { %v1973_v9 = vpack.c.bf16 %v1595_v0, %v1595_v0 }
0x22ef   :  { %1600 = vrot.lane.b32.xlu1 %v1973_v9, %s2437_s30 }
0x2361   :  { %v1601_v63 = vpop.permute.xlu1 %1600 }
0x2362   :  { %1603 = vst.msk [vmem:[#allocation4] sm:$0xf] %vm395_vm5, %v1601_v63 }
0x2369   :  { %v1604_v32 = vld [vmem:[#allocation4] sm:$0xf] }
0x236a   :  { %2162 = vmatmul.mubr.msk.bf16.vlgmr.msra.gmra.mxu1 %vm434_vm6, %v1604_v32 }
0x242a   :  { %v1642_v45 = vpop.f32.mrf.mxu1 }
0x242b   :  { %v1643_v2 = vadd.f32 %v3086_v39, %v1642_v45 }
0x242c   :  { %v2163_v58 = vpop.f32.mrf.mxu1 }
0x242d   :  { %v1648_v14 = vmul.f32 %v1643_v2, %v2702_v34 }
0x242e   :  { %v1645_v1 = vpop.f32.mrf.mxu1 }
0x242f   :  { %v1942_v3 = vmul.f32 -1.442695, %v1648_v14 }
0x2430   :  { %v2164_v60 = vpop.f32.mrf.mxu1 }
0x2431   :  { %2339 = vpow2.f32 %v1942_v3 }
0x243e   :  { %v2340_v29 = vpop.eup %2339 }
0x243f   :  { %v1652_v48 = vadd.f32 1.0, %v2340_v29 }
0x2441   :  { %2341 = vrcp.f32 %v1652_v48 }
0x244e   :  { %v2342_v19 = vpop.eup %2341 }
0x244f   :  { %v1655_v33 = vmul.f32 %v2342_v19, %v2702_v34 }
0x2451   :  { %v1656_v49 = vadd.f32 %v1655_v33, %v2709_v44 }
0x2453   :  { %1659 = vrot.lane.b32.xlu0 %v1656_v49, %s2437_s30  ;;  %v1657_v34 = vmul.f32 %v1656_v49, %v3095_v13 }
0x24c5   :  { %v1660_v5 = vpop.permute.xlu0 %1659 }
0x24c6   :  { %v1662_v50 = vmul.f32 %v1660_v5, %v1656_v49 }
0x24c8   :  { %1664 = vrot.lane.b32.xlu1 %v1662_v50, %s2444_s25 }
0x24cc   :  { %514 = vrot.lane.b32.xlu1 %v2719_v59, %s2444_s25 }
0x24d0   :  { %848 = vrot.lane.b32.xlu1 %v2831_v46, %s2444_s25 }
0x24d4   :  { %1182 = vrot.lane.b32.xlu1 %v2978_v22, %s2444_s25 }
0x24d8   :  { %1516 = vrot.lane.b32.xlu1 %v3099_v23, %s2444_s25 }
0x253a   :  { %v1665_v44 = vpop.permute.xlu1 %1664 }
0x253b   :  { %v1667_v39 = vadd.f32 %v1665_v44, %v1657_v34 }
0x253d   :  { %2343 = vtanh.f32 %v1667_v39 }
0x253e   :  { %v515_v53 = vpop.permute.xlu1 %514 }
0x253f   :  { %517 = vst.msk [vmem:[#allocation3] sm:$0xff] %vm122_vm1, %v515_v53 }
0x2542   :  { %v849_v55 = vpop.permute.xlu1 %848 }
0x2543   :  { %851 = vst.msk [vmem:[#allocation3 + $0x10] sm:$0xff] %vm122_vm1, %v849_v55 }
0x2546   :  { %v1183_v59 = vpop.permute.xlu1 %1182  ;;  %v1687_v23 = vld [vmem:[#allocation3] sm:$0xff] }
0x2547   :  { %1185 = vst.msk [vmem:[#allocation3 + $0x20] sm:$0xff] %vm122_vm1, %v1183_v59 }
0x254a   :  { %v2344_v46 = vpop.eup %2343  ;;  %v1517_v22 = vpop.permute.xlu1 %1516 }
0x254b   :  { %1519 = vst.msk [vmem:[#allocation3 + $0x30] sm:$0xff] %vm122_vm1, %v1517_v22  ;;  %1670 = vrot.lane.b32.xlu0 %v2344_v46, %s2437_s30 }
0x254e   :  { %v1691_v57 = vld [vmem:[#allocation3 + $0x20] sm:$0xff] }
0x254f   :  { %681 = vrot.lane.b32.xlu0 %v2775_v51, %s2444_s25 }
0x2552   :  { %v1693_v18 = vld [vmem:[#allocation3 + $0x30] sm:$0xff] }
0x2553   :  { %1015 = vrot.lane.b32.xlu0 %v2887_v35, %s2444_s25 }
0x2557   :  { %1349 = vrot.lane.b32.xlu0 %v3036_v52, %s2444_s25  ;;  %v1689_v52 = vld [vmem:[#allocation3 + $0x10] sm:$0xff] }
0x25bd   :  { %v1671_v11 = vpop.permute.xlu0 %1670 }
0x25be   :  { %v1673_v12 = vmul.f32 %v1671_v11, %v1656_v49 }
0x25c0   :  { %v1974_v13 = vpack.c.bf16 %v1673_v12, %v1673_v12  ;;  %1683 = vrot.lane.b32.xlu0 %v1673_v12, %s2444_s25 }
0x25c1   :  { %v682_v36 = vpop.permute.xlu0 %681 }
0x25c2   :  { %684 = vst.msk [vmem:[#allocation3 + $0x8] sm:$0xff] %vm122_vm1, %v682_v36  ;;  %1678 = vrot.lane.b32.xlu1 %v1974_v13, %s2445_s26 }
0x25c5   :  { %v1016_v20 = vpop.permute.xlu0 %1015 }
0x25c6   :  { %1018 = vst.msk [vmem:[#allocation3 + $0x18] sm:$0xff] %vm122_vm1, %v1016_v20 }
0x25c9   :  { %v1350_v51 = vpop.permute.xlu0 %1349  ;;  %v1688_v24 = vld [vmem:[#allocation3 + $0x8] sm:$0xff] }
0x25ca   :  { %1352 = vst.msk [vmem:[#allocation3 + $0x28] sm:$0xff] %vm122_vm1, %v1350_v51  ;;  %v1695_v35 = vpack.c.bf16 %v1688_v24, %v1687_v23 }
0x25cc   :  { %2169 = vmatprep.mubr.msk.bf16.mxu0 %vm122_vm1, %v1695_v35 }
0x25cd   :  { %v1690_v16 = vld [vmem:[#allocation3 + $0x18] sm:$0xff] }
0x25ce   :  { %v1696_v4 = vpack.c.bf16 %v1690_v16, %v1689_v52 }
0x25d0   :  { %2170 = vmatmul.mubr.msk.bf16.vlgmr.msra.gmra.mxu0 %vm122_vm1, %v1696_v4 }
0x25d1   :  { %v1692_v62 = vld [vmem:[#allocation3 + $0x28] sm:$0xff] }
0x25d2   :  { %v1697_v37 = vpack.c.bf16 %v1692_v62, %v1691_v57 }
0x25d4   :  { %2173 = vmatprep.mubr.msk.bf16.mxu0 %vm122_vm1, %v1697_v37 }
0x2632   :  { %v1684_v6 = vpop.permute.xlu0 %1683 }
0x2633   :  { %1686 = vst.msk [vmem:[#allocation3 + $0x38] sm:$0xff] %vm122_vm1, %v1684_v6 }
0x2634   :  { %v1679_v17 = vpop.permute.xlu1 %1678 }
0x2635   :  { %1681 = vst.msk [vmem:[#allocation4] sm:$0xf] %vm511_vm10, %v1679_v17 }
0x263a   :  { %v1694_v38 = vld [vmem:[#allocation3 + $0x38] sm:$0xff] }
0x263b   :  { %v1698_v56 = vpack.c.bf16 %v1694_v38, %v1693_v18 }
0x263d   :  { %2174 = vmatmul.mubr.msk.bf16.gmra.mxu0 %vm122_vm1, %v1698_v56 }
0x2690   :  { %v2171_v41 = vpop.f32.mrf.mxu0 }
0x2691   :  { %v1777_v8 = vadd.f32 %v2171_v41, %v1944_v40 }
0x2692   :  { %v1768_v15 = vpop.f32.mrf.mxu0 }
0x2693   :  { %v1953_v10 = vmul.f32 -1.442695, %v1777_v8  ;;  %v1769_v25 = vadd.f32 %v1944_v40, %v1768_v15 }
0x2694   :  { %v2172_v27 = vpop.f32.mrf.mxu0 }
0x2695   :  { %2345 = vpow2.f32 %v1953_v10  ;;  %v1951_v21 = vmul.f32 -1.442695, %v1769_v25  ;;  %v1780_v26 = vadd.f32 %v2172_v27, %v1944_v40 }
0x2696   :  { %v1771_v28 = vpop.f32.mrf.mxu0 }
0x2697   :  { %2347 = vpow2.f32 %v1951_v21  ;;  %v1954_v30 = vmul.f32 -1.442695, %v1780_v26  ;;  %v1772_v42 = vadd.f32 %v1944_v40, %v1771_v28 }
0x2699   :  { %2349 = vpow2.f32 %v1954_v30  ;;  %v1952_v43 = vmul.f32 -1.442695, %v1772_v42 }
0x269b   :  { %2351 = vpow2.f32 %v1952_v43 }
0x26a2   :  { %v2346_v31 = vpop.eup %2345 }
0x26a3   :  { %v1825_v54 = vadd.f32 1.0, %v2346_v31 }
0x26a4   :  { %v2348_v7 = vpop.eup %2347 }
0x26a5   :  { %2353 = vrcp.f32 %v1825_v54  ;;  %v1823_v0 = vadd.f32 1.0, %v2348_v7 }
0x26a6   :  { %v2350_v9 = vpop.eup %2349 }
0x26a7   :  { %2355 = vrcp.f32 %v1823_v0  ;;  %v1826_v63 = vadd.f32 1.0, %v2350_v9 }
0x26a8   :  { %v2352_v32 = vpop.eup %2351 }
0x26a9   :  { %2357 = vrcp.f32 %v1826_v63  ;;  %v1824_v45 = vadd.f32 1.0, %v2352_v32 }
0x26ab   :  { %2359 = vrcp.f32 %v1824_v45 }
0x26b2   :  { %v2354_v2 = vpop.eup %2353 }
0x26b3   :  { %1849 = vst [vmem:[%s3203_s8 + $0x10] sm:$0xff] %v2354_v2 }
0x26b4   :  { %v2356_v58 = vpop.eup %2355 }
0x26b5   :  { %1847 = vst [vmem:[%s3203_s8] sm:$0xff] %v2356_v58 }
0x26b6   :  { %v2358_v14 = vpop.eup %2357 }
0x26b7   :  { %1850 = vst [vmem:[%s3203_s8 + $0x18] sm:$0xff] %v2358_v14 }
0x26b8   :  { %v2360_v1 = vpop.eup %2359 }
0x26b9   :  { %1848 = vst [vmem:[%s3203_s8 + $0x8] sm:$0xff] %v2360_v1 }
0x26fd   :  { %v2175_v3 = vpop.f32.mrf.mxu0 }
0x26fe   :  { %v1793_v60 = vadd.f32 %v2175_v3, %v1944_v40 }
0x26ff   :  { %v1784_v29 = vpop.f32.mrf.mxu0 }
0x2700   :  { %v1957_v48 = vmul.f32 -1.442695, %v1793_v60  ;;  %v1785_v19 = vadd.f32 %v1944_v40, %v1784_v29 }
0x2701   :  { %v2176_v33 = vpop.f32.mrf.mxu0 }
0x2702   :  { %2361 = vpow2.f32 %v1957_v48  ;;  %v1955_v49 = vmul.f32 -1.442695, %v1785_v19  ;;  %v1796_v5 = vadd.f32 %v2176_v33, %v1944_v40 }
0x2703   :  { %v1787_v50 = vpop.f32.mrf.mxu0 }
0x2704   :  { %2363 = vpow2.f32 %v1955_v49  ;;  %v1958_v34 = vmul.f32 -1.442695, %v1796_v5  ;;  %v1788_v44 = vadd.f32 %v1944_v40, %v1787_v50 }
0x2706   :  { %2365 = vpow2.f32 %v1958_v34  ;;  %v1956_v39 = vmul.f32 -1.442695, %v1788_v44 }
0x2708   :  { %2367 = vpow2.f32 %v1956_v39 }
0x270f   :  { %v2362_v53 = vpop.eup %2361 }
0x2710   :  { %v1829_v55 = vadd.f32 1.0, %v2362_v53 }
0x2711   :  { %v2364_v59 = vpop.eup %2363 }
0x2712   :  { %2369 = vrcp.f32 %v1829_v55  ;;  %v1827_v47 = vadd.f32 1.0, %v2364_v59 }
0x2713   :  { %v2366_v46 = vpop.eup %2365 }
0x2714   :  { %2371 = vrcp.f32 %v1827_v47  ;;  %v1830_v22 = vadd.f32 1.0, %v2366_v46 }
0x2715   :  { %v2368_v61 = vpop.eup %2367 }
0x2716   :  { %2373 = vrcp.f32 %v1830_v22  ;;  %v1828_v11 = vadd.f32 1.0, %v2368_v61 }
0x2718   :  { %2375 = vrcp.f32 %v1828_v11 }
0x271f   :  { %v2370_v12 = vpop.eup %2369 }
0x2720   :  { %1853 = vst [vmem:[%s3203_s8 + $0x30] sm:$0xff] %v2370_v12 }
0x2721   :  { %v2372_v13 = vpop.eup %2371 }
0x2722   :  { %1851 = vst [vmem:[%s3203_s8 + $0x20] sm:$0xff] %v2372_v13 }
0x2723   :  { %v2374_v36 = vpop.eup %2373 }
0x2724   :  { %1854 = vst [vmem:[%s3203_s8 + $0x38] sm:$0xff] %v2374_v36 }
0x2725   :  { %v2376_v20 = vpop.eup %2375 }
0x2726   :  { %1852 = vst [vmem:[%s3203_s8 + $0x28] sm:$0xff] %v2376_v20 }
0x2727   :  { %1859 = vsyncpa [#allocation6], 1 }
0x2728   :  { %1860 = vsyncpa [#allocation8], 1 }

</bundles_post_ra>
